<compile_context>
chip_gen: v5e
topology: v5e:2x2
jax: 0.10.0
libtpu: 0.0.40
codegen_flags: <defaults>
</compile_context>

<pallas_src>
import jax
import jax.numpy as jnp
import numpy as np
from jax import lax
from jax.experimental import pallas as pl
from jax.experimental.pallas import tpu as pltpu

_LOG_EPS = 1e-6
_MVN_EPS = 1e-5


def fused_logmel_mvn_kernel(frames_ref, cs_ref, mel_ref, out_ref):
    """Frames -> windowed real-DFT power -> mel -> log, fused with time-axis MVN.

    frames_ref: (1, Lp, tT)  bf16  frames in (frame-sample, time) orientation
    cs_ref:     (2*Kp, Lp)   bf16  window-folded, stacked [cos; sin] DFT basis
    mel_ref:    (M, Kp)      f32   transposed mel filterbank (zero-padded bins)
    out_ref:    (1, M, T)    f32   full-T resident output block (index map (b,0,0));
                                   holds raw log-mel until the last time tile, then
                                   is MVN-normalized in place and written back once.
    """
    t = pl.program_id(1)
    n_t = pl.num_programs(1)
    t_tile = frames_ref.shape[-1]

    # One MXU matmul does windowing + real DFT: (2*Kp, tT), f32 accumulation.
    spec = jnp.dot(cs_ref[...], frames_ref[0], preferred_element_type=jnp.float32)
    kp = spec.shape[0] // 2
    re = spec[:kp, :]
    im = spec[kp:, :]
    power = re * re + im * im                                    # (Kp, tT) f32

    # Mel projection in f32 (tiny matmul; preserves small mel energies) + log.
    mel = jnp.dot(mel_ref[...], power, preferred_element_type=jnp.float32)
    logmel = jnp.log(mel + _LOG_EPS)                              # (M, tT) f32

    # Stash this tile into the resident full-T block: lane-dense stores at a
    # 128-aligned dynamic offset.
    start = pl.multiple_of(t * t_tile, t_tile)
    out_ref[0, :, pl.ds(start, t_tile)] = logmel

    # Finalize: exact two-pass MVN over time on the resident block, in place.
    @pl.when(t == n_t - 1)
    def _():
        full = out_ref[0]                                         # (M, T) f32
        mean = jnp.mean(full, axis=-1, keepdims=True)
        centered = full - mean
        var = jnp.mean(centered * centered, axis=-1, keepdims=True)
        out_ref[0] = centered * lax.rsqrt(var + _MVN_EPS)


def _pick_time_tile(T, t_tile):
    """Largest multiple of 128 that divides T and is <= t_tile (lane-dense tiles)."""
    assert T % 128 == 0, "pad the frame count to a multiple of 128 upstream"
    # TODO(synk): masked-tail path for T not a multiple of 128.
    tt = max(128, min(t_tile, T) - (min(t_tile, T) % 128))
    while T % tt:
        tt -= 128
    return tt


def _frame_signal(x, frame_len_padded, frame_shift, num_frames):
    """Gather-free framing: (B, n) f32 -> (B, Lp, T) bf16.

    Built from Lp//shift strided slices + reshape/transpose (XLA emits plain
    copies, not a gather HLO).  Frames are produced directly in (frame-sample,
    time) orientation so every downstream matmul/store is (feature, time).
    """
    B = x.shape[0]
    n_chunks = frame_len_padded // frame_shift
    need = (num_frames - 1) * frame_shift + frame_len_padded
    pad = max(0, need - x.shape[1])
    xp = jnp.pad(x, ((0, 0), (0, pad))).astype(jnp.bfloat16)
    chunks = []
    for c in range(n_chunks):
        seg = xp[:, c * frame_shift: c * frame_shift + num_frames * frame_shift]
        seg = seg.reshape(B, num_frames, frame_shift)     # seg[b,t,s] = x[b, t*shift + c*shift + s]
        chunks.append(jnp.transpose(seg, (0, 2, 1)))      # (B, shift, T)
    return jnp.concatenate(chunks, axis=1)                # (B, Lp, T)


def feat_extractor_forward(x, cs_basis, mel_t, *, frame_len, frame_shift, t_tile=512):
    """x: (B, n_samples) f32 waveform -> (B, M, T) f32 MVN-normalized log-mel.

    t_tile: 512 is right for v6e/v7x (2x256^2 MXU, amortizes grid-step overhead);
    use 128-256 on v5e (4x128^2 MXU).
    """
    B, n_samples = x.shape
    T = (n_samples - frame_len) // frame_shift + 1
    two_kp, Lp = cs_basis.shape
    Kp = two_kp // 2
    M, Kp2 = mel_t.shape
    assert Kp2 == Kp
    assert Lp % frame_shift == 0 and Lp >= frame_len

    tT = _pick_time_tile(T, t_tile)
    nT = T // tT

    frames = _frame_signal(x, Lp, frame_shift, T)         # (B, Lp, T) bf16, no gather
    # TODO(synk): build frames in-kernel from the raw waveform (pl.ANY ref +
    # per-chunk shifted matmuls) to remove this ~Lp/frame_shift x intermediate.

    cost = pl.CostEstimate(
        flops=int(B * T * (2 * two_kp * Lp + 2 * M * Kp)),
        transcendentals=int(B * T * M),
        bytes_accessed=int(frames.size * 2 + cs_basis.size * 2
                           + mel_t.size * 4 + B * M * T * 4),
    )

    out = pl.pallas_call(
        fused_logmel_mvn_kernel,
        out_shape=jax.ShapeDtypeStruct((B, M, T), jnp.float32),
        grid_spec=pltpu.PrefetchScalarGridSpec(
            num_scalar_prefetch=0,
            grid=(B, nT),
            in_specs=[
                pl.BlockSpec((1, Lp, tT), lambda b, t: (b, 0, t)),
                pl.BlockSpec((two_kp, Lp), lambda b, t: (0, 0)),
                pl.BlockSpec((M, Kp), lambda b, t: (0, 0)),
            ],
            # Resident full-T output block across the "arbitrary" time axis:
            # written back to HBM once per batch row, after in-place MVN.
            out_specs=pl.BlockSpec((1, M, T), lambda b, t: (b, 0, 0)),
        ),
        compiler_params=pltpu.CompilerParams(
            # Batch axis parallel (v7x megacore needs B >= 2); time axis is the
            # sequential accumulation/finalize axis.
            dimension_semantics=("parallel", "arbitrary"),
            # 32 MiB: load-bearing on v5e (16 MiB scoped default); comfortable
            # headroom for the resident M*T f32 block on v7x's 64 MiB VMEM.
            vmem_limit_bytes=32 * 1024 * 1024,
        ),
        cost_estimate=cost,
    )(frames, cs_basis, mel_t)
    return out


def make_params(frame_len, frame_shift, n_bins, n_mel, lane=128):
    """Deterministic synthetic feat-extractor parameters in MXU-friendly layout.

    Returns:
      cs_basis: (2*Kp, Lp) bf16 — Hamming window folded into stacked [cos; sin]
                real-DFT rows; K zero-padded to Kp (multiple of 128); frame
                length zero-padded to Lp (multiple of frame_shift).  All padding
                is zero-weight, hence exactly equivalent.
      mel_t:    (M, Kp)   f32  — transposed triangular mel filterbank.
    """
    L, K, M = frame_len, n_bins, n_mel
    Kp = ((K + lane - 1) // lane) * lane
    n_chunks = -(-L // frame_shift)
    Lp = n_chunks * frame_shift

    n = np.arange(L, dtype=np.float64)
    window = 0.54 - 0.46 * np.cos(2.0 * np.pi * n / (L - 1))     # Hamming

    k = np.arange(K, dtype=np.float64)
    ang = 2.0 * np.pi * np.outer(n, k) / L                       # (L, K)
    cos_w = (np.cos(ang) * window[:, None]).T                    # (K, L)
    sin_w = (-np.sin(ang) * window[:, None]).T                   # (K, L)

    cs_basis = np.zeros((2 * Kp, Lp), dtype=np.float64)
    cs_basis[:K, :L] = cos_w
    cs_basis[Kp:Kp + K, :L] = sin_w

    mel_fb = np.zeros((K, M), dtype=np.float64)
    centers = np.linspace(0, K - 1, M + 2)
    bins = np.arange(K, dtype=np.float64)
    for m in range(M):
        lo, c, hi = centers[m], centers[m + 1], centers[m + 2]
        up = np.clip((bins - lo) / max(c - lo, 1e-6), 0.0, 1.0)
        down = np.clip((hi - bins) / max(hi - c, 1e-6), 0.0, 1.0)
        mel_fb[:, m] = np.minimum(up, down)
    mel_t = np.zeros((M, Kp), dtype=np.float64)
    mel_t[:, :K] = mel_fb.T

    return jnp.asarray(cs_basis, jnp.bfloat16), jnp.asarray(mel_t, jnp.float32)


if __name__ == "__main__":
    # Small but tile-friendly shapes: two 512-wide time tiles so the resident
    # output block / finalize path across the "arbitrary" axis is exercised,
    # and B=2 so the "parallel" batch axis can use both v7x TensorCores.
    B = 2
    frame_len = 64
    frame_shift = 32
    T = 1024
    n_samples = frame_shift * (T - 1) + frame_len     # 32800
    n_bins = 33                                       # L//2 + 1, padded to Kp=128
    n_mel = 16

    key = jax.random.PRNGKey(0)
    x = jax.random.normal(key, (B, n_samples), dtype=jnp.float32)

    cs_basis, mel_t = make_params(frame_len, frame_shift, n_bins, n_mel)

    out = feat_extractor_forward(
        x, cs_basis, mel_t, frame_len=frame_len, frame_shift=frame_shift)
    out = jax.block_until_ready(out)
    assert out.shape == (B, n_mel, T), out.shape

    # Pure-JAX reference of the same forward (same bf16 frames / DFT basis,
    # f32 mel path, exact two-pass MVN).  Only matmul accumulation order /
    # f32-matmul precision regime differ -> modest tolerance.
    Lp = cs_basis.shape[1]
    Kp = cs_basis.shape[0] // 2
    frames = _frame_signal(x, Lp, frame_shift, T)                            # (B, Lp, T)
    spec = jnp.einsum("kl,blt->bkt", cs_basis, frames,
                      preferred_element_type=jnp.float32,
                      precision=lax.Precision.HIGHEST)                       # (B, 2Kp, T)
    power = spec[:, :Kp, :] ** 2 + spec[:, Kp:, :] ** 2
    mel = jnp.einsum("mk,bkt->bmt", mel_t, power,
                     preferred_element_type=jnp.float32,
                     precision=lax.Precision.HIGHEST)
    logmel = jnp.log(mel + _LOG_EPS)
    mean = jnp.mean(logmel, axis=2, keepdims=True)
    var = jnp.mean((logmel - mean) ** 2, axis=2, keepdims=True)
    ref = (logmel - mean) * lax.rsqrt(var + _MVN_EPS)
    np.testing.assert_allclose(np.asarray(out), np.asarray(ref), rtol=2e-2, atol=2e-2)

    print("KERNEL_OK")
</pallas_src>

<mosaic_0001>
module attributes {stable_mosaic.version = 11 : i64} {
  func.func @fused_logmel_mvn_kernel(%arg0: i32, %arg1: i32, %arg2: memref<1x64x512xbf16, #tpu.memory_space<vmem>>, %arg3: memref<256x64xbf16, #tpu.memory_space<vmem>>, %arg4: memref<16x128xf32, #tpu.memory_space<vmem>>, %arg5: memref<1x16x1024xf32, #tpu.memory_space<vmem>>) attributes {dimension_semantics = [#tpu.dimension_semantics<parallel>, #tpu.dimension_semantics<arbitrary>], iteration_bounds = array<i64: 2, 2>, scalar_prefetch = 0 : i64, scratch_operands = 0 : i64, tpu.core_type = #tpu.core_type<tc>, window_params = [{transform_indices = @transform_0, window_bounds = array<i64: 1, 64, 512>}, {pipeline_mode = #tpu.pipeline_mode<synchronous>, transform_indices = @transform_1, window_bounds = array<i64: 256, 64>}, {pipeline_mode = #tpu.pipeline_mode<synchronous>, transform_indices = @transform_2, window_bounds = array<i64: 16, 128>}, {transform_indices = @transform_3, window_bounds = array<i64: 1, 16, 1024>}]} {
    %c0 = arith.constant 0 : index
    %c0_0 = arith.constant 0 : index
    %0 = vector.load %arg3[%c0, %c0_0] : memref<256x64xbf16, #tpu.memory_space<vmem>>, vector<256x64xbf16>
    %c0_1 = arith.constant 0 : index
    %c0_2 = arith.constant 0 : index
    %c0_3 = arith.constant 0 : index
    %1 = vector.load %arg2[%c0_1, %c0_2, %c0_3] : memref<1x64x512xbf16, #tpu.memory_space<vmem>>, vector<1x64x512xbf16>
    %2 = vector.shape_cast %1 : vector<1x64x512xbf16> to vector<64x512xbf16>
    %cst = arith.constant dense<0.000000e+00> : vector<256x512xf32>
    %3 = tpu.matmul %0, %2, %cst {dimension_numbers = #tpu.dot_dimension_numbers<[1], [0], [0], [1], [0, 0, 1, 1], [], []>} : vector<256x64xbf16>, vector<64x512xbf16>, vector<256x512xf32> -> vector<256x512xf32>
    %4 = vector.extract_strided_slice %3 {offsets = [0, 0], sizes = [128, 512], strides = [1, 1]} : vector<256x512xf32> to vector<128x512xf32>
    %5 = vector.extract_strided_slice %3 {offsets = [128, 0], sizes = [128, 512], strides = [1, 1]} : vector<256x512xf32> to vector<128x512xf32>
    %6 = arith.mulf %4, %4 : vector<128x512xf32>
    %7 = arith.mulf %5, %5 : vector<128x512xf32>
    %8 = arith.addf %6, %7 : vector<128x512xf32>
    %c0_4 = arith.constant 0 : index
    %c0_5 = arith.constant 0 : index
    %9 = vector.load %arg4[%c0_4, %c0_5] : memref<16x128xf32, #tpu.memory_space<vmem>>, vector<16x128xf32>
    %cst_6 = arith.constant dense<0.000000e+00> : vector<16x512xf32>
    %10 = tpu.matmul %9, %8, %cst_6 {dimension_numbers = #tpu.dot_dimension_numbers<[1], [0], [0], [1], [0, 0, 1, 1], [], []>} : vector<16x128xf32>, vector<128x512xf32>, vector<16x512xf32> -> vector<16x512xf32>
    %cst_7 = arith.constant 9.99999997E-7 : f32
    %11 = vector.broadcast %cst_7 : f32 to vector<16x512xf32>
    %12 = arith.addf %10, %11 : vector<16x512xf32>
    %13 = math.log %12 : vector<16x512xf32>
    %c512_i32 = arith.constant 512 : i32
    %14 = arith.muli %arg1, %c512_i32 : i32
    %15 = tpu.assume_multiple %14, 512 : i32
    %c0_8 = arith.constant 0 : index
    %c0_9 = arith.constant 0 : index
    %16 = arith.index_cast %15 : i32 to index
    %17 = vector.load %arg5[%c0_8, %c0_9, %16] : memref<1x16x1024xf32, #tpu.memory_space<vmem>>, vector<1x16x512xf32>
    %18 = vector.shape_cast %17 : vector<1x16x512xf32> to vector<16x512xf32>
    %19 = vector.shape_cast %13 : vector<16x512xf32> to vector<1x16x512xf32>
    tpu.vector_store %arg5[%c0_8, %c0_9, %16], %19 {strides = array<i32>} : memref<1x16x1024xf32, #tpu.memory_space<vmem>>, vector<1x16x512xf32>,
    %c1_i32 = arith.constant 1 : i32
    %20 = arith.cmpi eq, %arg1, %c1_i32 : i32
    %21 = arith.extui %20 : i1 to i32
    %c0_i32 = arith.constant 0 : i32
    %22 = arith.cmpi ne, %21, %c0_i32 : i32
    scf.if %22 {
      %c0_10 = arith.constant 0 : index
      %c0_11 = arith.constant 0 : index
      %c0_12 = arith.constant 0 : index
      %23 = vector.load %arg5[%c0_10, %c0_11, %c0_12] : memref<1x16x1024xf32, #tpu.memory_space<vmem>>, vector<1x16x1024xf32>
      %24 = vector.shape_cast %23 : vector<1x16x1024xf32> to vector<16x1024xf32>
      %cst_13 = arith.constant dense<0.000000e+00> : vector<16xf32>
      %25 = vector.multi_reduction <add>, %24, %cst_13 [1] : vector<16x1024xf32> to vector<16xf32>
      %26 = vector.shape_cast %25 : vector<16xf32> to vector<16x1xf32>
      %cst_14 = arith.constant 1.024000e+03 : f32
      %27 = vector.broadcast %cst_14 : f32 to vector<16x1xf32>
      %28 = arith.divf %26, %27 : vector<16x1xf32>
      %29 = vector.broadcast %28 : vector<16x1xf32> to vector<16x1024xf32>
      %30 = arith.subf %24, %29 : vector<16x1024xf32>
      %31 = arith.mulf %30, %30 : vector<16x1024xf32>
      %cst_15 = arith.constant dense<0.000000e+00> : vector<16xf32>
      %32 = vector.multi_reduction <add>, %31, %cst_15 [1] : vector<16x1024xf32> to vector<16xf32>
      %33 = vector.shape_cast %32 : vector<16xf32> to vector<16x1xf32>
      %cst_16 = arith.constant 1.024000e+03 : f32
      %34 = vector.broadcast %cst_16 : f32 to vector<16x1xf32>
      %35 = arith.divf %33, %34 : vector<16x1xf32>
      %cst_17 = arith.constant 9.99999974E-6 : f32
      %36 = vector.broadcast %cst_17 : f32 to vector<16x1xf32>
      %37 = arith.addf %35, %36 : vector<16x1xf32>
      %38 = math.rsqrt %37 : vector<16x1xf32>
      %39 = vector.broadcast %38 : vector<16x1xf32> to vector<16x1024xf32>
      %40 = arith.mulf %30, %39 : vector<16x1024xf32>
      %c0_18 = arith.constant 0 : index
      %c0_19 = arith.constant 0 : index
      %c0_20 = arith.constant 0 : index
      %41 = vector.load %arg5[%c0_18, %c0_19, %c0_20] : memref<1x16x1024xf32, #tpu.memory_space<vmem>>, vector<1x16x1024xf32>
      %42 = vector.shape_cast %41 : vector<1x16x1024xf32> to vector<16x1024xf32>
      %43 = vector.shape_cast %40 : vector<16x1024xf32> to vector<1x16x1024xf32>
      tpu.vector_store %arg5[%c0_18, %c0_19, %c0_20], %43 {strides = array<i32>} : memref<1x16x1024xf32, #tpu.memory_space<vmem>>, vector<1x16x1024xf32>,
    } else {
    }
    return
  }
  func.func @transform_0(%arg0: i32, %arg1: i32) -> (i32, i32, i32) {
    %c0_i32 = arith.constant 0 : i32
    %c0_i32_0 = arith.constant 0 : i32
    return %arg0, %c0_i32, %arg1 : i32, i32, i32
  }
  func.func @transform_1(%arg0: i32, %arg1: i32) -> (i32, i32) {
    %c0_i32 = arith.constant 0 : i32
    %c0_i32_0 = arith.constant 0 : i32
    %c0_i32_1 = arith.constant 0 : i32
    return %c0_i32, %c0_i32_0 : i32, i32
  }
  func.func @transform_2(%arg0: i32, %arg1: i32) -> (i32, i32) {
    %c0_i32 = arith.constant 0 : i32
    %c0_i32_0 = arith.constant 0 : i32
    %c0_i32_1 = arith.constant 0 : i32
    return %c0_i32, %c0_i32_0 : i32, i32
  }
  func.func @transform_3(%arg0: i32, %arg1: i32) -> (i32, i32, i32) {
    %c0_i32 = arith.constant 0 : i32
    %c0_i32_0 = arith.constant 0 : i32
    %c0_i32_1 = arith.constant 0 : i32
    return %arg0, %c0_i32, %c0_i32_0 : i32, i32, i32
  }
}

</mosaic_0001>

<bundles_post_ra>
// kernel: tpu_custom_call.1
= control target key start
LH: loop header
LB: loop body
LE: loop exit
PB: predicated region body
PF: predicated region fallthrough
CT: control target
= control target key end

     0   :  { %8 = vsyncpa [#allocation3], 0  ;;  %s2872_s0 = inlined_call_operand.hbm [shape: bf16[2,64,1024], index: 0, kind: input, shape index: {}]   ;;  %s2873_s1 = inlined_call_operand.vmem [shape: bf16[256,64], index: 1, kind: input, shape index: {}]   ;;  %s2874_s2 = inlined_call_operand.vmem [shape: f32[16,128], index: 2, kind: input, shape index: {}]   ;;  %s2875_s3 = inlined_call_operand.hbm [shape: f32[2,16,1024], index: 3, kind: output, shape index: {}]  }
   0x1   :  { %10 = vsyncpa [#allocation3 + $0x1], 0 }
   0x2   :  { %11 = vsyncpa [#allocation4], 0 }
   0x3   :  { %13 = vsyncpa [#allocation4 + $0x1], 0  ;;  %s1949_s12 = smov 0   ;;  %s1951_s13 = smov 0  }
   0x4   :  { %s1953_s14 = smov 0   ;;  %s1955_s15 = smov 0  }
   0x5   :  { %s1957_s16 = smov 0   ;;  %s1959_s17 = smov 0  }
   0x6   :  { %s1961_s18 = smov 0   ;;  %s1963_s19 = smov 0  }
   0x7   :  { %s1965_s20 = smov 0   ;;  %s1967_s21 = smov 0  }
   0x8   :  { %s1969_s22 = smov 0  }
   0x9 LB: > { %2881 = sst [smem:[#allocation8_spill]] %s1889_s14  ;;  %s1395_s23 = sadd.s32 4294967295, %s1921_s22   ;;  %s1921_s22 = sphi %s1969_s22, %s19_s22   ;;  %s1917_s21 = sphi %s1967_s21, %s3002_s21   ;;  %s1913_s20 = sphi %s1965_s20, %s2995_s20   ;;  %s1909_s19 = sphi %s1963_s19, %s3001_s19   ;;  %s1905_s18 = sphi %s1961_s18, %s2994_s18   ;;  %s1901_s17 = sphi %s1959_s17, %s2993_s17   ;;  %s1897_s16 = sphi %s1957_s16, %s3000_s16   ;;  %s1893_s15 = sphi %s1955_s15, %s2999_s15   ;;  %s1889_s14 = sphi %s1953_s14, %s2991_s14   ;;  %s1885_s13 = sphi %s1951_s13, %s2998_s13   ;;  %s1881_s12 = sphi %s1949_s12, %s2997_s12  }
   0xa   : > { %2882 = sst [smem:[#allocation9_spill]] %s1901_s17  ;;  %s1396_s24 = sadd.s32 4294967294, %s1921_s22  }
   0xb   : > { %2883 = sst [smem:[#allocation10_spill]] %s1913_s20  ;;  %s28_s25 = sadd.s32 1, %s1913_s20 }
   0xc   : > { %s31_s26 = sadd.s32 1, %s1917_s21  ;;  %p29_p0 = scmp.ge.s32.totalorder %s28_s25, 2 }
   0xd   : > { %s40_s27 = sadd.s32 1, %s1901_s17  ;;  %p47_p1 = scmp.ne.s32.totalorder %s1901_s17, %s1897_s16 }
   0xe   : > { %p48_p2 = scmp.eq.s32.totalorder %s1921_s22, 0  ;;  %s3004_s25 = smov (%p29_p0, %s28_s25), 0 }
   0xf   : > { %2884 = sst [smem:[#allocation11_spill]] %s3004_s25  ;;  %s3006_s26 = smov (!%p29_p0, %s31_s26), %s1917_s21 }
  0x10   : > { %s36_s28 = ssub.s32 %s1913_s20, %s3004_s25  ;;  %p2015_p3 = por %p48_p2, %p47_p1 }
  0x11   : > { %p33_p4 = scmp.ge.s32.totalorder %s3006_s26, 2  ;;  %p53_p5 = scmp.ne.s32.totalorder %s1897_s16, %s1893_s15 }
  0x12   : > { %p54_p6 = scmp.eq.s32.totalorder %s1395_s23, 0  ;;  %s108_s30 = sadd.s32 1, %s1889_s14 }
  0x13   : > { %s3008_s26 = smov (%p33_p4, %s3006_s26), 0  ;;  %p118_p8 = scmp.ne.s32.totalorder %s1889_s14, %s1885_s13 }
  0x14   : > { %2886 = sst [smem:[#allocation12_spill]] %s3008_s26  ;;  %p2023_p7 = por %p54_p6, %p53_p5 }
  0x15   : > { %s35_s5 = ssub.s32 %s1917_s21, %s3008_s26  ;;  %p119_p9 = scmp.eq.s32.totalorder %s1395_s23, 3 }
  0x16   : > { %s37_s6 = sor.u32 %s36_s28, %s35_s5  ;;  %p106_p10 = scmp.eq.s32.totalorder %s35_s5, 0 }
  0x17   : > { %p38_p11 = scmp.eq.s32.totalorder %s37_s6, 0  ;;  %p2031_p12 = por %p119_p9, %p118_p8 }
  0x18   : > { %s2036_s8 = scalar_select %p106_p10, %s1889_s14, %s108_s30  }
  0x19   : > { %s2039_s9 = scalar_select %p38_p11, %s1901_s17, %s40_s27  }
  0x1a   : > { %2889 = sst [smem:[#allocation13_spill]] %s2036_s8  ;;  %p124_p13 = scmp.ne.s32.totalorder %s1885_s13, %s1881_s12 }
  0x1b   : > { %2890 = sst [smem:[#allocation14_spill]] %s2039_s9  ;;  %p125_p0 = scmp.eq.s32.totalorder %s1396_s24, 3 }
  0x1c   : > { %p1651_p1 = scmp.lt.s32.totalorder %s1921_s22, 4  ;;  %s151_s11 = sand.u32 1, %s1901_s17  }
  0x1d   : > { %p2044_p2 = por %p125_p0, %p124_p13  ;;  %s1399_s15 = sshll.u32 %s151_s11, 7 }
  0x1e   : > { %s1400_s23 = sshll.u32 %s1913_s20, 2  ;;  %s1401_s28 = sshll.u32 %s1917_s21, 6 }
  0x1f   : > { %s155_s5 = scalar_lea.vmem [#allocation2], %s1399_s15  ;;  %s160_s26 = sadd.s32 %s1401_s28, %s1400_s23 }
  0x20   : > { %s165_s6 = sshll.u32 %s155_s5, 4  ;;  %s1402_s30 = sshll.u32 %s160_s26, 2  ;;  %s166_s6 = int_to_ptr.vmem [resolvable:$true] %s165_s6 }
  0x21   : > { %p1644_p4 = pnand %p1651_p1, %p2015_p3  ;;  %s162_s25 = scalar_lea.hbm %s2872_s0, %s1402_s30 }
  0x22   : > { %s163_s9 = sshll.u32 %s162_s25, 4  ;;  %p1403_p5 = scmp.ge.s32.totalorder %s1921_s22, 1  ;;  %s164_s9 = int_to_ptr.hbm [resolvable:$true] %s163_s9 }
  0x23   : > { %s152_s8 = scalar_lea.sflag [#allocation3], %s151_s11  ;;  %s1923_s17 = smov 512  }
  0x24   : > { %s1924_s14 = smov 256   ;;  %s1925_s20 = smov 16  }
  0x25   : > { %1646 = dma.hbm_to_vmem [thread:$0]  (!%p1644_p4), %s164_s9, 2048, %s166_s6, %s152_s8, %s1923_s17, %s1924_s14, %s1925_s20  }
  0x26   : > { %p173_p6 = scmp.lt.s32.totalorder %s1921_s22, 5 }
  0x28   : > { %p174_p8 = pnand %p1403_p5, %p173_p6 }
  0x2a   : > { %177 = sbr.rel (%p174_p8) target bundleno = 968 (0x3c8), region = 32 }
  0x2f   : > { %s179_s26 = sand.u32 1, %s1897_s16  }
  0x30   : > { %s1404_s29 = sshll.u32 %s179_s26, 7  ;;  %s180_s15 = scalar_lea.sflag [#allocation3], %s179_s26 }
  0x31   : > { %s2059_s23 = scalar_lea.vmem [#allocation2], %s1404_s29 }
  0x32   : > { %1872 = dma.done.wait (%p2023_p7), %s180_s15, 2048  }
  0x33   : > { %1874 = vsyncadd (%p2023_p7), %s180_s15, 4294965248  ;;  %v1520_v0 = vld [vmem:[%s2059_s23 + $0x60] sm:$0xf]  ;;  %v1636_v1 = vld [vmem:[%s2059_s23 + $0x6c] sm:$0xf0]  ;;  %vm417_vm0 = vcmask 523264  }
  0x34   : > { %v1634_v2 = vld [vmem:[%s2059_s23 + $0x64] sm:$0xf]  ;;  %v1521_v3 = vor.u32 %v1636_v1, %v1520_v0  ;;  %v1522_v4 = vld [vmem:[%s2059_s23 + $0x70] sm:$0xf0]  ;;  %v1528_v5 = vld [vmem:[%s2059_s23 + $0x68] sm:$0xf] }
  0x35   : > { %v1637_v6 = vld [vmem:[%s2059_s23 + $0x74] sm:$0xf0]  ;;  %v1525_v7 = vor.u32 %v1634_v2, %v1522_v4  ;;  %v1635_v9 = vld [vmem:[%s2059_s23 + $0x6c] sm:$0xf]  ;;  %v1530_v10 = vld [vmem:[%s2059_s23 + $0x78] sm:$0xf0] }
  0x36   : > { %v1529_v8 = vor.u32 %v1637_v6, %v1528_v5  ;;  %v1504_v11 = vld [vmem:[%s2059_s23 + $0x40] sm:$0xf]  ;;  %470 = vmatpush.bf16.msra.mxu0 %v1521_v3  ;;  %v1533_v12 = vor.u32 %v1635_v9, %v1530_v10  ;;  %v1632_v13 = vld [vmem:[%s2059_s23 + $0x4c] sm:$0xf0]  ;;  %v1630_v14 = vld [vmem:[%s2059_s23 + $0x44] sm:$0xf] }
  0x37   : > { %v1506_v15 = vld [vmem:[%s2059_s23 + $0x50] sm:$0xf0]  ;;  %559 = vmatpush.bf16.msra.mxu1 %v1525_v7  ;;  %v1505_v16 = vor.u32 %v1632_v13, %v1504_v11  ;;  %v1512_v18 = vld [vmem:[%s2059_s23 + $0x48] sm:$0xf]  ;;  %v1633_v19 = vld [vmem:[%s2059_s23 + $0x54] sm:$0xf0] }
  0x38   : > { %648 = vmatpush.bf16.msra.mxu2 %v1529_v8  ;;  %v1509_v17 = vor.u32 %v1630_v14, %v1506_v15  ;;  %v1631_v20 = vld [vmem:[%s2059_s23 + $0x4c] sm:$0xf]  ;;  %737 = vmatpush.bf16.msra.mxu3 %v1533_v12  ;;  %v1513_v21 = vor.u32 %v1633_v19, %v1512_v18  ;;  %v1514_v22 = vld [vmem:[%s2059_s23 + $0x58] sm:$0xf0]  ;;  %v1488_v23 = vld [vmem:[%s2059_s23 + $0x20] sm:$0xf] }
  0x39   : > { %v1628_v24 = vld [vmem:[%s2059_s23 + $0x2c] sm:$0xf0]  ;;  %v1517_v25 = vor.u32 %v1631_v20, %v1514_v22  ;;  %v1626_v26 = vld [vmem:[%s2059_s23 + $0x24] sm:$0xf]  ;;  %v1490_v27 = vld [vmem:[%s2059_s23 + $0x30] sm:$0xf0] }
  0x3a   : > { %v1496_v28 = vld [vmem:[%s2059_s23 + $0x28] sm:$0xf]  ;;  %471 = vmatpush.bf16.msra.mxu0 %v1505_v16  ;;  %v1489_v29 = vor.u32 %v1628_v24, %v1488_v23  ;;  %v1629_v30 = vld [vmem:[%s2059_s23 + $0x34] sm:$0xf0]  ;;  %v1627_v31 = vld [vmem:[%s2059_s23 + $0x2c] sm:$0xf]  ;;  %v1493_v33 = vor.u32 %v1626_v26, %v1490_v27 }
  0x3b   : > { %v1498_v32 = vld [vmem:[%s2059_s23 + $0x38] sm:$0xf0]  ;;  %560 = vmatpush.bf16.msra.mxu1 %v1509_v17  ;;  %v1497_v34 = vor.u32 %v1629_v30, %v1496_v28  ;;  %v1472_v35 = vld [vmem:[%s2059_s23] sm:$0xf]  ;;  %v1624_v36 = vld [vmem:[%s2059_s23 + $0xc] sm:$0xf0] }
  0x3c   : > { %649 = vmatpush.bf16.msra.mxu2 %v1513_v21  ;;  %v1622_v37 = vld [vmem:[%s2059_s23 + $0x4] sm:$0xf]  ;;  %738 = vmatpush.bf16.msra.mxu3 %v1517_v25  ;;  %v1501_v38 = vor.u32 %v1627_v31, %v1498_v32  ;;  %v1474_v39 = vld [vmem:[%s2059_s23 + $0x10] sm:$0xf0]  ;;  %v1480_v40 = vld [vmem:[%s2059_s23 + $0x8] sm:$0xf]  ;;  %v1473_v44 = vor.u32 %v1624_v36, %v1472_v35 }
  0x3d   : > { %v1625_v41 = vld [vmem:[%s2059_s23 + $0x14] sm:$0xf0]  ;;  %v1623_v42 = vld [vmem:[%s2059_s23 + $0xc] sm:$0xf]  ;;  %v1482_v43 = vld [vmem:[%s2059_s23 + $0x18] sm:$0xf0]  ;;  %v1477_v45 = vor.u32 %v1622_v37, %v1474_v39 }
  0x3e   : > { %472 = vmatpush.bf16.msra.mxu0 %v1489_v29  ;;  %v1481_v46 = vor.u32 %v1625_v41, %v1480_v40  ;;  %v1485_v47 = vor.u32 %v1623_v42, %v1482_v43  ;;  %v1606_v48 = vld [vmem:[%s2873_s1] sm:$0xff]  ;;  %v1607_v49 = vld [vmem:[%s2873_s1 + $0x8] sm:$0xff]  ;;  %v1608_v50 = vld [vmem:[%s2873_s1 + $0x10] sm:$0xff]  ;;  %s204_s14 = sand.u32 1, %s1885_s13   ;;  %s1598_s17 = sshll.u32 %s1905_s18, 9 }
  0x3f   : > { %561 = vmatpush.bf16.msra.mxu1 %v1493_v33  ;;  %v1609_v51 = vld [vmem:[%s2873_s1 + $0x18] sm:$0xff]  ;;  %v1610_v52 = vld [vmem:[%s2873_s1 + $0x20] sm:$0xff]  ;;  %v1611_v53 = vld [vmem:[%s2873_s1 + $0x28] sm:$0xff]  ;;  %s1405_s20 = sshll.u32 %s204_s14, 7  ;;  %s1125_s25 = sshra.s32 %s1598_s17, 7 }
  0x40   : > { %650 = vmatpush.bf16.msra.mxu2 %v1497_v34  ;;  %739 = vmatpush.bf16.msra.mxu3 %v1501_v38  ;;  %v1612_v54 = vld [vmem:[%s2873_s1 + $0x30] sm:$0xff]  ;;  %v1613_v55 = vld [vmem:[%s2873_s1 + $0x38] sm:$0xff]  ;;  %v1614_v56 = vld [vmem:[%s2873_s1 + $0x40] sm:$0xff]  ;;  %s1599_s4 = sshll.u32 %s1125_s25, 3  ;;  %s2692_s8 = scalar_lea.vmem [#allocation5], %s1405_s20 }
  0x41   : > { %v1615_v0 = vld [vmem:[%s2873_s1 + $0x48] sm:$0xff]  ;;  %v1616_v9 = vld [vmem:[%s2873_s1 + $0x50] sm:$0xff]  ;;  %v1617_v18 = vld [vmem:[%s2873_s1 + $0x58] sm:$0xff]  ;;  %s2695_s9 = scalar_lea.vmem %s2692_s8, %s1599_s4 [#allocation5]  ;;  %p1600_p3 = scmp.ne.s32.totalorder %s1905_s18, 1 }
  0x42   : > { %473 = vmatpush.bf16.msra.mxu0 %v1473_v44  ;;  %v1618_v27 = vld [vmem:[%s2873_s1 + $0x60] sm:$0xff]  ;;  %v1619_v36 = vld [vmem:[%s2873_s1 + $0x68] sm:$0xff] }
  0x43   : > { %562 = vmatpush.bf16.msra.mxu1 %v1477_v45  ;;  %v1620_v45 = vld [vmem:[%s2873_s1 + $0x70] sm:$0xff] }
  0x44   : > { %651 = vmatpush.bf16.msra.mxu2 %v1481_v46  ;;  %740 = vmatpush.bf16.msra.mxu3 %v1485_v47 }
  0x45   : > { %1534 = vmatmul.msk.bf16.vlgmr.msra.gmra.mxu0 %vm417_vm0, %v1606_v48 }
  0x46   : > { %1550 = vmatmul.msk.bf16.vlgmr.msra.gmra.mxu1 %vm417_vm0, %v1606_v48 }
  0x47   : > { %1566 = vmatmul.msk.bf16.vlgmr.msra.gmra.mxu2 %vm417_vm0, %v1606_v48  ;;  %1582 = vmatmul.msk.bf16.vlgmr.msra.gmra.mxu3 %vm417_vm0, %v1606_v48 }
  0x55   : > { %1535 = vmatmul.msk.bf16.gmra.mxu0 %vm417_vm0, %v1607_v49 }
  0x56   : > { %1551 = vmatmul.msk.bf16.gmra.mxu1 %vm417_vm0, %v1607_v49 }
  0x57   : > { %1567 = vmatmul.msk.bf16.gmra.mxu2 %vm417_vm0, %v1607_v49  ;;  %1583 = vmatmul.msk.bf16.gmra.mxu3 %vm417_vm0, %v1607_v49 }
  0x65   : > { %1536 = vmatmul.msk.bf16.gmra.mxu0 %vm417_vm0, %v1608_v50 }
  0x66   : > { %1552 = vmatmul.msk.bf16.gmra.mxu1 %vm417_vm0, %v1608_v50 }
  0x67   : > { %1568 = vmatmul.msk.bf16.gmra.mxu2 %vm417_vm0, %v1608_v50  ;;  %1584 = vmatmul.msk.bf16.gmra.mxu3 %vm417_vm0, %v1608_v50 }
  0x75   : > { %1537 = vmatmul.msk.bf16.gmra.mxu0 %vm417_vm0, %v1609_v51 }
  0x76   : > { %1553 = vmatmul.msk.bf16.gmra.mxu1 %vm417_vm0, %v1609_v51 }
  0x77   : > { %1569 = vmatmul.msk.bf16.gmra.mxu2 %vm417_vm0, %v1609_v51  ;;  %1585 = vmatmul.msk.bf16.gmra.mxu3 %vm417_vm0, %v1609_v51 }
  0x85   : > { %1538 = vmatmul.msk.bf16.gmra.mxu0 %vm417_vm0, %v1610_v52 }
  0x86   : > { %1554 = vmatmul.msk.bf16.gmra.mxu1 %vm417_vm0, %v1610_v52 }
  0x87   : > { %1570 = vmatmul.msk.bf16.gmra.mxu2 %vm417_vm0, %v1610_v52  ;;  %1586 = vmatmul.msk.bf16.gmra.mxu3 %vm417_vm0, %v1610_v52 }
  0x95   : > { %1539 = vmatmul.msk.bf16.gmra.mxu0 %vm417_vm0, %v1611_v53 }
  0x96   : > { %1555 = vmatmul.msk.bf16.gmra.mxu1 %vm417_vm0, %v1611_v53 }
  0x97   : > { %1571 = vmatmul.msk.bf16.gmra.mxu2 %vm417_vm0, %v1611_v53  ;;  %1587 = vmatmul.msk.bf16.gmra.mxu3 %vm417_vm0, %v1611_v53 }
  0xa5   : > { %1540 = vmatmul.msk.bf16.gmra.mxu0 %vm417_vm0, %v1612_v54 }
  0xa6   : > { %1556 = vmatmul.msk.bf16.gmra.mxu1 %vm417_vm0, %v1612_v54 }
  0xa7   : > { %1572 = vmatmul.msk.bf16.gmra.mxu2 %vm417_vm0, %v1612_v54  ;;  %1588 = vmatmul.msk.bf16.gmra.mxu3 %vm417_vm0, %v1612_v54  ;;  %v1621_v54 = vld [vmem:[%s2873_s1 + $0x78] sm:$0xff] }
  0xb5   : > { %1541 = vmatmul.msk.bf16.gmra.mxu0 %vm417_vm0, %v1613_v55 }
  0xb6   : > { %1557 = vmatmul.msk.bf16.gmra.mxu1 %vm417_vm0, %v1613_v55 }
  0xb7   : > { %1573 = vmatmul.msk.bf16.gmra.mxu2 %vm417_vm0, %v1613_v55  ;;  %1589 = vmatmul.msk.bf16.gmra.mxu3 %vm417_vm0, %v1613_v55 }
  0xc2   : > { %v2156_v57 = vpop.f32.mrf.mxu0 }
  0xc3   : > { %v2158_v58 = vpop.f32.mrf.mxu1 }
  0xc5   : > { %1542 = vmatmul.msk.bf16.gmra.mxu0 %vm417_vm0, %v1614_v56 }
  0xc6   : > { %1558 = vmatmul.msk.bf16.gmra.mxu1 %vm417_vm0, %v1614_v56 }
  0xc7   : > { %1574 = vmatmul.msk.bf16.gmra.mxu2 %vm417_vm0, %v1614_v56  ;;  %1590 = vmatmul.msk.bf16.gmra.mxu3 %vm417_vm0, %v1614_v56 }
  0xca   : > { %v2164_v59 = vpop.f32.mrf.mxu2  ;;  %v2166_v60 = vpop.f32.mrf.mxu3 }
  0xcb   : > { %v2168_v61 = vpop.f32.mrf.mxu0  ;;  %v2170_v62 = vpop.f32.mrf.mxu1 }
  0xd2   : > { %v2172_v63 = vpop.f32.mrf.mxu2  ;;  %v2177_v1 = vpop.f32.mrf.mxu3 }
  0xd3   : > { %v2179_v2 = vpop.f32.mrf.mxu0  ;;  %v2181_v3 = vpop.f32.mrf.mxu1 }
  0xd5   : > { %1543 = vmatmul.msk.bf16.gmra.mxu0 %vm417_vm0, %v1615_v0 }
  0xd6   : > { %1559 = vmatmul.msk.bf16.gmra.mxu1 %vm417_vm0, %v1615_v0 }
  0xd7   : > { %1575 = vmatmul.msk.bf16.gmra.mxu2 %vm417_vm0, %v1615_v0  ;;  %1591 = vmatmul.msk.bf16.gmra.mxu3 %vm417_vm0, %v1615_v0 }
  0xda   : > { %v2187_v4 = vpop.f32.mrf.mxu2  ;;  %v2189_v5 = vpop.f32.mrf.mxu3 }
  0xdb   : > { %v2191_v6 = vpop.f32.mrf.mxu0  ;;  %v2193_v7 = vpop.f32.mrf.mxu1 }
  0xe2   : > { %v2195_v8 = vpop.f32.mrf.mxu2  ;;  %v2200_v10 = vpop.f32.mrf.mxu3 }
  0xe3   : > { %v2202_v11 = vpop.f32.mrf.mxu0  ;;  %v2204_v12 = vpop.f32.mrf.mxu1 }
  0xe5   : > { %1544 = vmatmul.msk.bf16.gmra.mxu0 %vm417_vm0, %v1616_v9 }
  0xe6   : > { %1560 = vmatmul.msk.bf16.gmra.mxu1 %vm417_vm0, %v1616_v9 }
  0xe7   : > { %1576 = vmatmul.msk.bf16.gmra.mxu2 %vm417_vm0, %v1616_v9  ;;  %1592 = vmatmul.msk.bf16.gmra.mxu3 %vm417_vm0, %v1616_v9 }
  0xea   : > { %v2210_v13 = vpop.f32.mrf.mxu2  ;;  %v2212_v14 = vpop.f32.mrf.mxu3 }
  0xeb   : > { %v2214_v15 = vpop.f32.mrf.mxu0  ;;  %v2216_v16 = vpop.f32.mrf.mxu1 }
  0xf2   : > { %v2218_v17 = vpop.f32.mrf.mxu2  ;;  %v2223_v19 = vpop.f32.mrf.mxu3 }
  0xf3   : > { %v2225_v20 = vpop.f32.mrf.mxu0  ;;  %v2227_v21 = vpop.f32.mrf.mxu1 }
  0xf5   : > { %1545 = vmatmul.msk.bf16.gmra.mxu0 %vm417_vm0, %v1617_v18 }
  0xf6   : > { %1561 = vmatmul.msk.bf16.gmra.mxu1 %vm417_vm0, %v1617_v18 }
  0xf7   : > { %1577 = vmatmul.msk.bf16.gmra.mxu2 %vm417_vm0, %v1617_v18  ;;  %1593 = vmatmul.msk.bf16.gmra.mxu3 %vm417_vm0, %v1617_v18 }
  0xfa   : > { %v2233_v22 = vpop.f32.mrf.mxu2  ;;  %v2235_v23 = vpop.f32.mrf.mxu3 }
  0xfb   : > { %v2237_v24 = vpop.f32.mrf.mxu0  ;;  %v2239_v25 = vpop.f32.mrf.mxu1 }
 0x102   : > { %v2241_v26 = vpop.f32.mrf.mxu2  ;;  %v2246_v28 = vpop.f32.mrf.mxu3 }
 0x103   : > { %v2248_v29 = vpop.f32.mrf.mxu0  ;;  %v2250_v30 = vpop.f32.mrf.mxu1 }
 0x105   : > { %1546 = vmatmul.msk.bf16.gmra.mxu0 %vm417_vm0, %v1618_v27 }
 0x106   : > { %1562 = vmatmul.msk.bf16.gmra.mxu1 %vm417_vm0, %v1618_v27 }
 0x107   : > { %1578 = vmatmul.msk.bf16.gmra.mxu2 %vm417_vm0, %v1618_v27  ;;  %1594 = vmatmul.msk.bf16.gmra.mxu3 %vm417_vm0, %v1618_v27 }
 0x10a   : > { %v2256_v31 = vpop.f32.mrf.mxu2  ;;  %v2258_v32 = vpop.f32.mrf.mxu3 }
 0x10b   : > { %2892 = vst [vmem:[#allocation15_spill] sm:$0xff] %v2256_v31  ;;  %v2260_v33 = vpop.f32.mrf.mxu0  ;;  %v2262_v34 = vpop.f32.mrf.mxu1 }
 0x10c   : > { %2893 = vst [vmem:[#allocation16_spill] sm:$0xff] %v2258_v32 }
 0x112   : > { %v2264_v35 = vpop.f32.mrf.mxu2  ;;  %v2269_v37 = vpop.f32.mrf.mxu3 }
 0x113   : > { %2894 = vst [vmem:[#allocation17_spill] sm:$0xff] %v2264_v35  ;;  %v2271_v38 = vpop.f32.mrf.mxu0  ;;  %v2273_v39 = vpop.f32.mrf.mxu1 }
 0x114   : > { %2895 = vst [vmem:[#allocation18_spill] sm:$0xff] %v2269_v37  ;;  %v822_v37 = vmul.f32 %v2156_v57, %v2156_v57  ;;  %v825_v57 = vmul.f32 %v2166_v60, %v2166_v60  ;;  %v828_v60 = vmul.f32 %v2172_v63, %v2172_v63 }
 0x115   : > { %1547 = vmatmul.msk.bf16.gmra.mxu0 %vm417_vm0, %v1619_v36 }
 0x116   : > { %1563 = vmatmul.msk.bf16.gmra.mxu1 %vm417_vm0, %v1619_v36 }
 0x117   : > { %1579 = vmatmul.msk.bf16.gmra.mxu2 %vm417_vm0, %v1619_v36  ;;  %1595 = vmatmul.msk.bf16.gmra.mxu3 %vm417_vm0, %v1619_v36 }
 0x11a   : > { %v2279_v40 = vpop.f32.mrf.mxu2  ;;  %v2281_v41 = vpop.f32.mrf.mxu3 }
 0x11b   : > { %2896 = vst [vmem:[#allocation19_spill] sm:$0xff] %v2281_v41  ;;  %v2283_v42 = vpop.f32.mrf.mxu0  ;;  %v2285_v43 = vpop.f32.mrf.mxu1 }
 0x122   : > { %v2287_v44 = vpop.f32.mrf.mxu2  ;;  %v2292_v46 = vpop.f32.mrf.mxu3 }
 0x123   : > { %v2294_v47 = vpop.f32.mrf.mxu0  ;;  %v2296_v48 = vpop.f32.mrf.mxu1 }
 0x125   : > { %1548 = vmatmul.msk.bf16.gmra.mxu0 %vm417_vm0, %v1620_v45 }
 0x126   : > { %1564 = vmatmul.msk.bf16.gmra.mxu1 %vm417_vm0, %v1620_v45 }
 0x127   : > { %1580 = vmatmul.msk.bf16.gmra.mxu2 %vm417_vm0, %v1620_v45  ;;  %1596 = vmatmul.msk.bf16.gmra.mxu3 %vm417_vm0, %v1620_v45 }
 0x12a   : > { %v2302_v49 = vpop.f32.mrf.mxu2  ;;  %v2304_v50 = vpop.f32.mrf.mxu3 }
 0x12b   : > { %v2306_v51 = vpop.f32.mrf.mxu0  ;;  %v2308_v52 = vpop.f32.mrf.mxu1 }
 0x132   : > { %v2310_v53 = vpop.f32.mrf.mxu2  ;;  %v2315_v55 = vpop.f32.mrf.mxu3 }
 0x133   : > { %2897 = vst [vmem:[#allocation20_spill] sm:$0xff] %v2310_v53  ;;  %v2317_v56 = vpop.f32.mrf.mxu0  ;;  %v2319_v0 = vpop.f32.mrf.mxu1 }
 0x134   : > { %2898 = vst [vmem:[#allocation21_spill] sm:$0xff] %v2315_v55 }
 0x135   : > { %2899 = vst [vmem:[#allocation22_spill] sm:$0xff] %v2317_v56  ;;  %1549 = vmatmul.msk.bf16.gmra.mxu0 %vm417_vm0, %v1621_v54 }
 0x136   : > { %2900 = vst [vmem:[#allocation23_spill] sm:$0xff] %v2319_v0  ;;  %1565 = vmatmul.msk.bf16.gmra.mxu1 %vm417_vm0, %v1621_v54 }
 0x137   : > { %1581 = vmatmul.msk.bf16.gmra.mxu2 %vm417_vm0, %v1621_v54  ;;  %1597 = vmatmul.msk.bf16.gmra.mxu3 %vm417_vm0, %v1621_v54  ;;  %v823_v54 = vmul.f32 %v2158_v58, %v2158_v58 }
 0x13a   : > { %v2325_v9 = vpop.f32.mrf.mxu2  ;;  %v2327_v18 = vpop.f32.mrf.mxu3 }
 0x13b   : > { %2901 = vst [vmem:[#allocation24_spill] sm:$0xff] %v2325_v9  ;;  %v2329_v27 = vpop.f32.mrf.mxu0  ;;  %v2331_v36 = vpop.f32.mrf.mxu1 }
 0x13c   : > { %2902 = vst [vmem:[#allocation25_spill] sm:$0xff] %v2327_v18 }
 0x13d   : > { %2903 = vst [vmem:[#allocation26_spill] sm:$0xff] %v2331_v36 }
 0x142   : > { %v2333_v45 = vpop.f32.mrf.mxu2  ;;  %v2335_v32 = vpop.f32.mrf.mxu3 }
 0x143   : > { %2904 = vst [vmem:[#allocation27_spill] sm:$0xff] %v2333_v45  ;;  %v515_v31 = vpop.f32.mrf.mxu0  ;;  %v604_v41 = vpop.f32.mrf.mxu1  ;;  %v824_v45 = vmul.f32 %v2164_v59, %v2164_v59 }
 0x144   : > { %2905 = vst [vmem:[#allocation28_spill] sm:$0xff] %v2335_v32  ;;  %v886_v35 = vmul.f32 %v515_v31, %v515_v31  ;;  %v887_v9 = vmul.f32 %v604_v41, %v604_v41  ;;  %v826_v31 = vmul.f32 %v2168_v61, %v2168_v61 }
 0x146   : > { %v2341_v0 = vadd.f32 %v886_v35, %v822_v37  ;;  %v2343_v18 = vadd.f32 %v887_v9, %v823_v54  ;;  %v827_v35 = vmul.f32 %v2170_v62, %v2170_v62  ;;  %v830_v62 = vmul.f32 %v2179_v2, %v2179_v2 }
 0x148   : > { %2906 = vst [vmem:[#allocation29_spill] sm:$0xff] %v2341_v0  ;;  %v829_v0 = vmul.f32 %v2177_v1, %v2177_v1  ;;  %v832_v1 = vmul.f32 %v2187_v4, %v2187_v4 }
 0x149   : > { %2907 = vst [vmem:[#allocation30_spill] sm:$0xff] %v2343_v18 }
 0x14a   : > { %v693_v56 = vpop.f32.mrf.mxu2  ;;  %v782_v32 = vpop.f32.mrf.mxu3 }
 0x14b   : > { %v888_v55 = vmul.f32 %v693_v56, %v693_v56  ;;  %v517_v36 = vpop.f32.mrf.mxu0  ;;  %v889_v53 = vmul.f32 %v782_v32, %v782_v32  ;;  %v606_v41 = vpop.f32.mrf.mxu1 }
 0x14c   : > { %v890_v58 = vmul.f32 %v517_v36, %v517_v36  ;;  %v891_v37 = vmul.f32 %v606_v41, %v606_v41 }
 0x14d   : > { %v2353_v9 = vadd.f32 %v888_v55, %v824_v45  ;;  %v2357_v59 = vadd.f32 %v889_v53, %v825_v57  ;;  %v831_v53 = vmul.f32 %v2181_v3, %v2181_v3  ;;  %v834_v3 = vmul.f32 %v2191_v6, %v2191_v6 }
 0x14e   : > { %v2355_v54 = vadd.f32 %v890_v58, %v826_v31  ;;  %v2359_v56 = vadd.f32 %v891_v37, %v827_v35 }
 0x14f   : > { %2908 = vst [vmem:[#allocation31_spill] sm:$0xff] %v2353_v9 }
 0x150   : > { %2909 = vst [vmem:[#allocation32_spill] sm:$0xff] %v2355_v54  ;;  %v2509_v54 = vmul.f32 %v2250_v30, %v2250_v30  ;;  %v2529_v30 = vmul.f32 %v2279_v40, %v2279_v40  ;;  %v870_v40 = vmul.f32 %v2294_v47, %v2294_v47  ;;  %v875_v47 = vmul.f32 %v2308_v52, %v2308_v52  ;;  %v2944_v52 = vld [vmem:[#allocation22_spill] sm:$0xff] }
 0x151   : > { %2910 = vst [vmem:[#allocation33_spill] sm:$0xff] %v2357_v59 }
 0x152   : > { %2911 = vst [vmem:[#allocation34_spill] sm:$0xff] %v2359_v56  ;;  %v695_v18 = vpop.f32.mrf.mxu2  ;;  %v784_v32 = vpop.f32.mrf.mxu3  ;;  %v2505_v56 = vmul.f32 %v2248_v29, %v2248_v29  ;;  %v2525_v29 = vmul.f32 %v2273_v39, %v2273_v39  ;;  %v2545_v39 = vmul.f32 %v2292_v46, %v2292_v46 }
 0x153   : > { %v892_v61 = vmul.f32 %v695_v18, %v695_v18  ;;  %v520_v36 = vpop.f32.mrf.mxu0  ;;  %v893_v55 = vmul.f32 %v784_v32, %v784_v32  ;;  %v609_v31 = vpop.f32.mrf.mxu1  ;;  %2940 = vst [vmem:[#allocation63_spill] sm:$0xff] %v2529_v30 }
 0x154   : > { %v894_v45 = vmul.f32 %v520_v36, %v520_v36  ;;  %v895_v57 = vmul.f32 %v609_v31, %v609_v31  ;;  %v833_v36 = vmul.f32 %v2189_v5, %v2189_v5  ;;  %v836_v5 = vmul.f32 %v2195_v8, %v2195_v8 }
 0x155   : > { %v2369_v58 = vadd.f32 %v892_v61, %v828_v60  ;;  %v2373_v63 = vadd.f32 %v893_v55, %v829_v0  ;;  %v835_v0 = vmul.f32 %v2193_v7, %v2193_v7  ;;  %v838_v7 = vmul.f32 %v2202_v11, %v2202_v11 }
 0x156   : > { %v2371_v41 = vadd.f32 %v894_v45, %v830_v62  ;;  %v2375_v18 = vadd.f32 %v895_v57, %v831_v53 }
 0x157   : > { %2912 = vst [vmem:[#allocation35_spill] sm:$0xff] %v2369_v58 }
 0x158   : > { %2913 = vst [vmem:[#allocation36_spill] sm:$0xff] %v2371_v41 }
 0x159   : > { %2914 = vst [vmem:[#allocation37_spill] sm:$0xff] %v2373_v63 }
 0x15a   : > { %2915 = vst [vmem:[#allocation38_spill] sm:$0xff] %v2375_v18  ;;  %v698_v35 = vpop.f32.mrf.mxu2  ;;  %v787_v37 = vpop.f32.mrf.mxu3  ;;  %v2521_v18 = vmul.f32 %v2271_v38, %v2271_v38  ;;  %v2541_v38 = vmul.f32 %v2287_v44, %v2287_v44  ;;  %v874_v44 = vmul.f32 %v2306_v51, %v2306_v51 }
 0x15b   : > { %v896_v2 = vmul.f32 %v698_v35, %v698_v35  ;;  %v522_v32 = vpop.f32.mrf.mxu0  ;;  %v897_v60 = vmul.f32 %v787_v37, %v787_v37  ;;  %v611_v62 = vpop.f32.mrf.mxu1 }
 0x15c   : > { %v898_v61 = vmul.f32 %v522_v32, %v522_v32  ;;  %v899_v55 = vmul.f32 %v611_v62, %v611_v62  ;;  %v837_v32 = vmul.f32 %v2200_v10, %v2200_v10  ;;  %v840_v10 = vmul.f32 %v2210_v13, %v2210_v13 }
 0x15d   : > { %v2385_v45 = vadd.f32 %v896_v2, %v832_v1  ;;  %v2389_v4 = vadd.f32 %v897_v60, %v833_v36  ;;  %v839_v36 = vmul.f32 %v2204_v12, %v2204_v12  ;;  %v842_v12 = vmul.f32 %v2214_v15, %v2214_v15 }
 0x15e   : > { %v2387_v31 = vadd.f32 %v898_v61, %v834_v3  ;;  %v2391_v53 = vadd.f32 %v899_v55, %v835_v0 }
 0x15f   : > { %2916 = vst [vmem:[#allocation39_spill] sm:$0xff] %v2385_v45 }
 0x160   : > { %2917 = vst [vmem:[#allocation40_spill] sm:$0xff] %v2387_v31 }
 0x161   : > { %2918 = vst [vmem:[#allocation41_spill] sm:$0xff] %v2389_v4 }
 0x162   : > { %2919 = vst [vmem:[#allocation42_spill] sm:$0xff] %v2391_v53  ;;  %v700_v57 = vpop.f32.mrf.mxu2  ;;  %v789_v35 = vpop.f32.mrf.mxu3  ;;  %v882_v53 = vmul.f32 %v2329_v27, %v2329_v27 }
 0x163   : > { %v900_v6 = vmul.f32 %v700_v57, %v700_v57  ;;  %v525_v37 = vpop.f32.mrf.mxu0  ;;  %v901_v1 = vmul.f32 %v789_v35, %v789_v35  ;;  %v614_v3 = vpop.f32.mrf.mxu1 }
 0x164   : > { %v902_v2 = vmul.f32 %v525_v37, %v525_v37  ;;  %v903_v60 = vmul.f32 %v614_v3, %v614_v3  ;;  %v841_v37 = vmul.f32 %v2212_v14, %v2212_v14  ;;  %v844_v14 = vmul.f32 %v2218_v17, %v2218_v17 }
 0x165   : > { %v2401_v61 = vadd.f32 %v900_v6, %v836_v5  ;;  %v2405_v8 = vadd.f32 %v901_v1, %v837_v32  ;;  %v843_v32 = vmul.f32 %v2216_v16, %v2216_v16  ;;  %v846_v16 = vmul.f32 %v2225_v20, %v2225_v20 }
 0x166   : > { %v2403_v62 = vadd.f32 %v902_v2, %v838_v7  ;;  %v2407_v0 = vadd.f32 %v903_v60, %v839_v36 }
 0x167   : > { %2920 = vst [vmem:[#allocation43_spill] sm:$0xff] %v2401_v61 }
 0x168   : > { %2921 = vst [vmem:[#allocation44_spill] sm:$0xff] %v2403_v62 }
 0x169   : > { %2922 = vst [vmem:[#allocation45_spill] sm:$0xff] %v2405_v8 }
 0x16a   : > { %2923 = vst [vmem:[#allocation46_spill] sm:$0xff] %v2407_v0  ;;  %v703_v55 = vpop.f32.mrf.mxu2  ;;  %v792_v57 = vpop.f32.mrf.mxu3 }
 0x16b   : > { %v904_v11 = vmul.f32 %v703_v55, %v703_v55  ;;  %v527_v35 = vpop.f32.mrf.mxu0  ;;  %v905_v5 = vmul.f32 %v792_v57, %v792_v57  ;;  %v616_v7 = vpop.f32.mrf.mxu1 }
 0x16c   : > { %v906_v6 = vmul.f32 %v527_v35, %v527_v35  ;;  %v907_v1 = vmul.f32 %v616_v7, %v616_v7  ;;  %v845_v35 = vmul.f32 %v2223_v19, %v2223_v19  ;;  %v848_v19 = vmul.f32 %v2233_v22, %v2233_v22 }
 0x16d   : > { %v2417_v2 = vadd.f32 %v904_v11, %v840_v10  ;;  %v2421_v13 = vadd.f32 %v905_v5, %v841_v37  ;;  %v847_v37 = vmul.f32 %v2227_v21, %v2227_v21  ;;  %v850_v21 = vmul.f32 %v2237_v24, %v2237_v24 }
 0x16e   : > { %v2419_v3 = vadd.f32 %v906_v6, %v842_v12  ;;  %v2423_v36 = vadd.f32 %v907_v1, %v843_v32 }
 0x16f   : > { %2924 = vst [vmem:[#allocation47_spill] sm:$0xff] %v2417_v2 }
 0x170   : > { %2925 = vst [vmem:[#allocation48_spill] sm:$0xff] %v2419_v3 }
 0x171   : > { %2926 = vst [vmem:[#allocation49_spill] sm:$0xff] %v2421_v13 }
 0x172   : > { %2927 = vst [vmem:[#allocation50_spill] sm:$0xff] %v2423_v36  ;;  %v705_v60 = vpop.f32.mrf.mxu2  ;;  %v794_v55 = vpop.f32.mrf.mxu3  ;;  %v2943_v36 = vld [vmem:[#allocation21_spill] sm:$0xff] }
 0x173   : > { %v908_v15 = vmul.f32 %v705_v60, %v705_v60  ;;  %v530_v57 = vpop.f32.mrf.mxu0  ;;  %v909_v10 = vmul.f32 %v794_v55, %v794_v55  ;;  %v619_v12 = vpop.f32.mrf.mxu1  ;;  %v2573_v3 = vmul.f32 %v2943_v36, %v2943_v36 }
 0x174   : > { %v910_v11 = vmul.f32 %v530_v57, %v530_v57  ;;  %v911_v5 = vmul.f32 %v619_v12, %v619_v12  ;;  %v849_v57 = vmul.f32 %v2235_v23, %v2235_v23  ;;  %v852_v23 = vmul.f32 %v2241_v26, %v2241_v26 }
 0x175   : > { %v2433_v6 = vadd.f32 %v908_v15, %v844_v14  ;;  %v2437_v17 = vadd.f32 %v909_v10, %v845_v35  ;;  %v851_v35 = vmul.f32 %v2239_v25, %v2239_v25  ;;  %v853_v25 = vmul.f32 %v2246_v28, %v2246_v28 }
 0x176   : > { %v2435_v7 = vadd.f32 %v910_v11, %v846_v16  ;;  %v2439_v32 = vadd.f32 %v911_v5, %v847_v37 }
 0x177   : > { %2928 = vst [vmem:[#allocation51_spill] sm:$0xff] %v2433_v6  ;;  %v2517_v6 = vmul.f32 %v2262_v34, %v2262_v34  ;;  %v2537_v34 = vmul.f32 %v2285_v43, %v2285_v43  ;;  %v2557_v43 = vmul.f32 %v2304_v50, %v2304_v50  ;;  %v2942_v50 = vld [vmem:[#allocation26_spill] sm:$0xff] }
 0x178   : > { %2929 = vst [vmem:[#allocation52_spill] sm:$0xff] %v2435_v7  ;;  %v883_v0 = vmul.f32 %v2942_v50, %v2942_v50  ;;  %v2947_v50 = vld [vmem:[#allocation25_spill] sm:$0xff] }
 0x179   : > { %2930 = vst [vmem:[#allocation53_spill] sm:$0xff] %v2437_v17  ;;  %v2513_v17 = vmul.f32 %v2260_v33, %v2260_v33  ;;  %v2533_v33 = vmul.f32 %v2283_v42, %v2283_v42  ;;  %v871_v42 = vmul.f32 %v2296_v48, %v2296_v48 }
 0x17a   : > { %2931 = vst [vmem:[#allocation54_spill] sm:$0xff] %v2439_v32  ;;  %v708_v1 = vpop.f32.mrf.mxu2  ;;  %v797_v60 = vpop.f32.mrf.mxu3  ;;  %v878_v32 = vmul.f32 %v2944_v52, %v2944_v52  ;;  %v2949_v52 = vld [vmem:[#allocation28_spill] sm:$0xff] }
 0x17b   : > { %v912_v20 = vmul.f32 %v708_v1, %v708_v1  ;;  %v532_v55 = vpop.f32.mrf.mxu0  ;;  %v913_v14 = vmul.f32 %v797_v60, %v797_v60  ;;  %v621_v16 = vpop.f32.mrf.mxu1 }
 0x17c   : > { %v914_v15 = vmul.f32 %v532_v55, %v532_v55  ;;  %v915_v10 = vmul.f32 %v621_v16, %v621_v16 }
 0x17d   : > { %v2449_v11 = vadd.f32 %v912_v20, %v848_v19  ;;  %v2453_v22 = vadd.f32 %v913_v14, %v849_v57 }
 0x17e   : > { %v2451_v12 = vadd.f32 %v914_v15, %v850_v21  ;;  %v2455_v37 = vadd.f32 %v915_v10, %v851_v35 }
 0x17f   : > { %2932 = vst [vmem:[#allocation55_spill] sm:$0xff] %v2449_v11 }
 0x180   : > { %2933 = vst [vmem:[#allocation56_spill] sm:$0xff] %v2451_v12 }
 0x181   : > { %2934 = vst [vmem:[#allocation57_spill] sm:$0xff] %v2453_v22  ;;  %v2553_v22 = vmul.f32 %v2302_v49, %v2302_v49  ;;  %v2941_v49 = vld [vmem:[#allocation20_spill] sm:$0xff] }
 0x182   : > { %2935 = vst [vmem:[#allocation58_spill] sm:$0xff] %v2455_v37  ;;  %v710_v5 = vpop.f32.mrf.mxu2  ;;  %v799_v1 = vpop.f32.mrf.mxu3  ;;  %v2946_v37 = vld [vmem:[#allocation24_spill] sm:$0xff] }
 0x183   : > { %v916_v24 = vmul.f32 %v710_v5, %v710_v5  ;;  %v2459_v60 = vpop.f32.mrf.mxu0  ;;  %v917_v55 = vmul.f32 %v799_v1, %v799_v1  ;;  %v2463_v19 = vpop.f32.mrf.mxu1 }
 0x185   : > { %v2465_v20 = vadd.f32 %v916_v24, %v852_v23  ;;  %v2467_v57 = vadd.f32 %v917_v55, %v853_v25 }
 0x187   : > { %2936 = vst [vmem:[#allocation59_spill] sm:$0xff] %v2465_v20  ;;  %v2567_v20 = vmul.f32 %v2941_v49, %v2941_v49  ;;  %v880_v49 = vmul.f32 %v2946_v37, %v2946_v37 }
 0x188   : > { %2937 = vst [vmem:[#allocation60_spill] sm:$0xff] %v2467_v57 }
 0x18a   : > { %v2469_v21 = vpop.f32.mrf.mxu2  ;;  %v2471_v14 = vpop.f32.mrf.mxu3 }
 0x18b   : > { %2938 = vst [vmem:[#allocation61_spill] sm:$0xff] %v2469_v21  ;;  %v2473_v15 = vpop.f32.mrf.mxu0  ;;  %v2475_v26 = vpop.f32.mrf.mxu1 }
 0x18c   : > { %2939 = vst [vmem:[#allocation62_spill] sm:$0xff] %v2471_v14 }
 0x192   : > { %v2477_v16 = vpop.f32.mrf.mxu2  ;;  %v2479_v35 = vpop.f32.mrf.mxu3 }
 0x193   : > { %v2481_v28 = vpop.f32.mrf.mxu0  ;;  %v2483_v10 = vpop.f32.mrf.mxu1 }
 0x19a   : > { %v2485_v5 = vpop.f32.mrf.mxu2  ;;  %v2487_v23 = vpop.f32.mrf.mxu3 }
 0x19b   : > { %v542_v24 = vpop.f32.mrf.mxu0  ;;  %v2489_v1 = vpop.f32.mrf.mxu1 }
 0x1a2   : > { %v2491_v25 = vpop.f32.mrf.mxu2  ;;  %v2493_v55 = vpop.f32.mrf.mxu3 }
 0x1a3   : > { %v545_v59 = vpop.f32.mrf.mxu0  ;;  %v634_v9 = vpop.f32.mrf.mxu1 }
 0x1a4   : > { %v934_v30 = vmul.f32 %v545_v59, %v545_v59 }
 0x1aa   : > { %v2495_v63 = vpop.f32.mrf.mxu2  ;;  %v2497_v58 = vpop.f32.mrf.mxu3 }
 0x1ab   : > { %v547_v4 = vpop.f32.mrf.mxu0  ;;  %v636_v45 = vpop.f32.mrf.mxu1 }
 0x1ac   : > { %v938_v27 = vmul.f32 %v547_v4, %v547_v4  ;;  %v939_v12 = vmul.f32 %v636_v45, %v636_v45  ;;  %v918_v4 = vmul.f32 %v2459_v60, %v2459_v60  ;;  %v919_v45 = vmul.f32 %v2463_v19, %v2463_v19 }
 0x1ad   : > { %v998_v19 = vadd.f32 %v934_v30, %v870_v40  ;;  %v936_v30 = vmul.f32 %v2495_v63, %v2495_v63  ;;  %v937_v40 = vmul.f32 %v2497_v58, %v2497_v58 }
 0x1ae   : > { %v1002_v59 = vadd.f32 %v938_v27, %v874_v44 }
 0x1b2   : > { %v2499_v8 = vpop.f32.mrf.mxu2  ;;  %v2501_v61 = vpop.f32.mrf.mxu3 }
 0x1b3   : > { %v550_v13 = vpop.f32.mrf.mxu0  ;;  %v639_v2 = vpop.f32.mrf.mxu1 }
 0x1b4   : > { %v942_v48 = vmul.f32 %v550_v13, %v550_v13  ;;  %v943_v62 = vmul.f32 %v639_v2, %v639_v2  ;;  %v881_v2 = vmul.f32 %v2947_v50, %v2947_v50 }
 0x1b6   : > { %v1006_v21 = vadd.f32 %v942_v48, %v878_v32  ;;  %v931_v32 = vmul.f32 %v2489_v1, %v2489_v1 }
 0x1ba   : > { %v728_v41 = vpop.f32.mrf.mxu2  ;;  %v817_v46 = vpop.f32.mrf.mxu3 }
 0x1bb   : > { %v552_v11 = vpop.f32.mrf.mxu0  ;;  %v641_v57 = vpop.f32.mrf.mxu1  ;;  %v944_v48 = vmul.f32 %v728_v41, %v728_v41 }
 0x1bc   : > { %v946_v31 = vmul.f32 %v552_v11, %v552_v11  ;;  %v947_v51 = vmul.f32 %v641_v57, %v641_v57  ;;  %v2945_v11 = vld [vmem:[#allocation23_spill] sm:$0xff] }
 0x1bd   : > { %v879_v7 = vmul.f32 %v2945_v11, %v2945_v11  ;;  %v2948_v57 = vld [vmem:[#allocation27_spill] sm:$0xff] }
 0x1be   : > { %v1010_v13 = vadd.f32 %v946_v31, %v882_v53  ;;  %v1011_v14 = vadd.f32 %v947_v51, %v883_v0  ;;  %v884_v36 = vmul.f32 %v2948_v57, %v2948_v57  ;;  %v885_v31 = vmul.f32 %v2949_v52, %v2949_v52  ;;  %v2955_v57 = vld [vmem:[#allocation62_spill] sm:$0xff]  ;;  %v2957_v52 = vld [vmem:[#allocation15_spill] sm:$0xff] }
 0x1bf   : > { %v935_v53 = vmul.f32 %v634_v9, %v634_v9  ;;  %v1007_v37 = vadd.f32 %v943_v62, %v879_v7  ;;  %v922_v0 = vmul.f32 %v2473_v15, %v2473_v15  ;;  %v930_v51 = vmul.f32 %v542_v24, %v542_v24 }
 0x1c0   : > { %1016 = vmatpush.msrb.mxu0 %v1010_v13  ;;  %1039 = vmatpush.msrb.mxu1 %v1011_v14  ;;  %v1003_v9 = vadd.f32 %v939_v12, %v875_v47  ;;  %v926_v62 = vmul.f32 %v2481_v28, %v2481_v28  ;;  %v945_v7 = vmul.f32 %v817_v46, %v817_v46  ;;  %v2950_v46 = vld [vmem:[#allocation19_spill] sm:$0xff] }
 0x1c1   : > { %v927_v14 = vmul.f32 %v2483_v10, %v2483_v10  ;;  %v999_v15 = vadd.f32 %v935_v53, %v871_v42  ;;  %v923_v24 = vmul.f32 %v2475_v26, %v2475_v26  ;;  %v941_v12 = vmul.f32 %v2501_v61, %v2501_v61 }
 0x1c2   : > { %v730_v11 = vpop.f32.mrf.mxu2  ;;  %1017 = vmatpush.msrb.mxu0 %v1006_v21  ;;  %v819_v50 = vpop.f32.mrf.mxu3  ;;  %1040 = vmatpush.msrb.mxu1 %v1007_v37  ;;  %v940_v21 = vmul.f32 %v2499_v8, %v2499_v8  ;;  %v994_v1 = vadd.f32 %v930_v51, %v2533_v33  ;;  %v995_v8 = vadd.f32 %v931_v32, %v2537_v34  ;;  %v2959_v37 = vld [vmem:[#allocation16_spill] sm:$0xff] }
 0x1c3   : > { %v948_v13 = vmul.f32 %v730_v11, %v730_v11  ;;  %v949_v60 = vmul.f32 %v819_v50, %v819_v50  ;;  %v1008_v10 = vadd.f32 %v944_v48, %v880_v49  ;;  %v1009_v26 = vadd.f32 %v945_v7, %v881_v2  ;;  %v2954_v49 = vld [vmem:[#allocation18_spill] sm:$0xff]  ;;  %v2962_v32 = vld [vmem:[#allocation48_spill] sm:$0xff] }
 0x1c4   : > { %1018 = vmatpush.msrb.mxu0 %v1002_v59  ;;  %1041 = vmatpush.msrb.mxu1 %v1003_v9  ;;  %v990_v61 = vadd.f32 %v926_v62, %v2521_v18  ;;  %v932_v42 = vmul.f32 %v2491_v25, %v2491_v25  ;;  %v991_v63 = vadd.f32 %v927_v14, %v2525_v29  ;;  %v2961_v11 = vld [vmem:[#allocation54_spill] sm:$0xff]  ;;  %v2964_v50 = vld [vmem:[#allocation44_spill] sm:$0xff]  ;;  %v2966_v62 = vld [vmem:[#allocation59_spill] sm:$0xff] }
 0x1c5   : > { %v1012_v41 = vadd.f32 %v948_v13, %v884_v36  ;;  %v1013_v28 = vadd.f32 %v949_v60, %v885_v31  ;;  %v1004_v33 = vadd.f32 %v940_v21, %v2567_v20  ;;  %v933_v34 = vmul.f32 %v2493_v55, %v2493_v55  ;;  %v2956_v36 = vld [vmem:[#allocation56_spill] sm:$0xff]  ;;  %v2963_v13 = vld [vmem:[#allocation50_spill] sm:$0xff]  ;;  %v2970_v14 = vld [vmem:[#allocation55_spill] sm:$0xff] }
 0x1c6   : > { %1019 = vmatpush.msrb.mxu0 %v998_v19  ;;  %1042 = vmatpush.msrb.mxu1 %v999_v15  ;;  %v1005_v58 = vadd.f32 %v941_v12, %v2573_v3  ;;  %v986_v44 = vadd.f32 %v922_v0, %v2513_v17  ;;  %v928_v18 = vmul.f32 %v2485_v5, %v2485_v5  ;;  %v2960_v0 = vld [vmem:[#allocation52_spill] sm:$0xff]  ;;  %v2965_v9 = vld [vmem:[#allocation46_spill] sm:$0xff]  ;;  %v2971_v21 = vld [vmem:[#allocation57_spill] sm:$0xff] }
 0x1c7   : > { %1062 = vmatpush.msrb.mxu2 %v1012_v41  ;;  %1085 = vmatpush.msrb.mxu3 %v1013_v28  ;;  %v987_v25 = vadd.f32 %v923_v24, %v2517_v6  ;;  %v1000_v29 = vadd.f32 %v936_v30, %v2553_v22  ;;  %v929_v20 = vmul.f32 %v2487_v23, %v2487_v23  ;;  %v2967_v7 = vld [vmem:[#allocation60_spill] sm:$0xff]  ;;  %v2969_v19 = vld [vmem:[#allocation42_spill] sm:$0xff]  ;;  %v2974_v24 = vld [vmem:[#allocation51_spill] sm:$0xff] }
 0x1c8   : > { %1020 = vmatpush.msrb.mxu0 %v994_v1  ;;  %1043 = vmatpush.msrb.mxu1 %v995_v8  ;;  %v1001_v55 = vadd.f32 %v937_v40, %v2557_v43  ;;  %v982_v3 = vadd.f32 %v918_v4, %v2505_v56  ;;  %v924_v17 = vmul.f32 %v2477_v16, %v2477_v16  ;;  %v2951_v56 = vld [vmem:[#allocation17_spill] sm:$0xff]  ;;  %v2958_v4 = vld [vmem:[#allocation58_spill] sm:$0xff]  ;;  %v2968_v60 = vld [vmem:[#allocation40_spill] sm:$0xff] }
 0x1c9   : > { %1063 = vmatpush.msrb.mxu2 %v1008_v10  ;;  %1086 = vmatpush.msrb.mxu3 %v1009_v26  ;;  %v983_v5 = vadd.f32 %v919_v45, %v2509_v54  ;;  %v996_v6 = vadd.f32 %v932_v42, %v2541_v38  ;;  %v865_v22 = vmul.f32 %v2950_v46, %v2950_v46  ;;  %v2952_v16 = vld [vmem:[#allocation61_spill] sm:$0xff]  ;;  %v2953_v54 = vld [vmem:[#allocation63_spill] sm:$0xff]  ;;  %v2972_v15 = vld [vmem:[#allocation36_spill] sm:$0xff] }
 0x1ca   : > { %1021 = vmatpush.msrb.mxu0 %v990_v61  ;;  %1044 = vmatpush.msrb.mxu1 %v991_v63  ;;  %v925_v23 = vmul.f32 %v2479_v35, %v2479_v35  ;;  %v997_v43 = vadd.f32 %v933_v34, %v2545_v39  ;;  %v860_v47 = vmul.f32 %v2951_v56, %v2951_v56  ;;  %v2973_v41 = vld [vmem:[#allocation38_spill] sm:$0xff]  ;;  %v2975_v12 = vld [vmem:[#allocation53_spill] sm:$0xff]  ;;  %v2976_v28 = vld [vmem:[#allocation32_spill] sm:$0xff] }
 0x1cb   : > { %1064 = vmatpush.msrb.mxu2 %v1004_v33  ;;  %1087 = vmatpush.msrb.mxu3 %v1005_v58  ;;  %v920_v27 = vmul.f32 %v2952_v16, %v2952_v16  ;;  %v992_v38 = vadd.f32 %v928_v18, %v2953_v54  ;;  %v861_v2 = vmul.f32 %v2954_v49, %v2954_v49  ;;  %v2977_v1 = vld [vmem:[#allocation34_spill] sm:$0xff]  ;;  %v2978_v30 = vld [vmem:[#allocation47_spill] sm:$0xff]  ;;  %v2979_v8 = vld [vmem:[#allocation49_spill] sm:$0xff] }
 0x1cc   : > { %1022 = vmatpush.msrb.mxu0 %v986_v44  ;;  %1045 = vmatpush.msrb.mxu1 %v987_v25  ;;  %v921_v35 = vmul.f32 %v2955_v57, %v2955_v57  ;;  %v993_v39 = vadd.f32 %v929_v20, %v865_v22  ;;  %v856_v31 = vmul.f32 %v2957_v52, %v2957_v52  ;;  %v2980_v10 = vld [vmem:[#allocation29_spill] sm:$0xff]  ;;  %v2981_v40 = vld [vmem:[#allocation30_spill] sm:$0xff]  ;;  %v2982_v26 = vld [vmem:[#allocation43_spill] sm:$0xff] }
 0x1cd   : > { %1065 = vmatpush.msrb.mxu2 %v1000_v29  ;;  %1088 = vmatpush.msrb.mxu3 %v1001_v55  ;;  %v988_v53 = vadd.f32 %v924_v17, %v860_v47  ;;  %v857_v45 = vmul.f32 %v2959_v37, %v2959_v37  ;;  %v989_v51 = vadd.f32 %v925_v23, %v861_v2  ;;  %v1014_v61 = vld [vmem:[%s2874_s2] sm:$0xff]  ;;  %v2983_v42 = vld [vmem:[#allocation45_spill] sm:$0xff]  ;;  %v1015_v25 = vld [vmem:[%s2874_s2 + $0x8] sm:$0xff] }
 0x1ce   : > { %1023 = vmatpush.msrb.mxu0 %v982_v3  ;;  %1046 = vmatpush.msrb.mxu1 %v983_v5  ;;  %v984_v59 = vadd.f32 %v920_v27, %v856_v31  ;;  %v2984_v63 = vld [vmem:[#allocation39_spill] sm:$0xff]  ;;  %v2985_v33 = vld [vmem:[#allocation41_spill] sm:$0xff] }
 0x1cf   : > { %1066 = vmatpush.msrb.mxu2 %v996_v6  ;;  %1089 = vmatpush.msrb.mxu3 %v997_v43  ;;  %v985_v48 = vadd.f32 %v921_v35, %v857_v45  ;;  %v2986_v34 = vld [vmem:[#allocation35_spill] sm:$0xff]  ;;  %v2987_v58 = vld [vmem:[#allocation37_spill] sm:$0xff] }
 0x1d0   : > { %1024 = vmatpush.msrb.mxu0 %v2956_v36  ;;  %1047 = vmatpush.msrb.mxu1 %v2958_v4  ;;  %v2988_v44 = vld [vmem:[#allocation31_spill] sm:$0xff]  ;;  %v2989_v18 = vld [vmem:[#allocation33_spill] sm:$0xff] }
 0x1d1   : > { %1067 = vmatpush.msrb.mxu2 %v992_v38  ;;  %1090 = vmatpush.msrb.mxu3 %v993_v39 }
 0x1d2   : > { %1025 = vmatpush.msrb.mxu0 %v2960_v0  ;;  %1048 = vmatpush.msrb.mxu1 %v2961_v11 }
 0x1d3   : > { %1068 = vmatpush.msrb.mxu2 %v988_v53  ;;  %1091 = vmatpush.msrb.mxu3 %v989_v51 }
 0x1d4   : > { %1026 = vmatpush.msrb.mxu0 %v2962_v32  ;;  %1049 = vmatpush.msrb.mxu1 %v2963_v13 }
 0x1d5   : > { %1069 = vmatpush.msrb.mxu2 %v984_v59  ;;  %1092 = vmatpush.msrb.mxu3 %v985_v48 }
 0x1d6   : > { %1027 = vmatpush.msrb.mxu0 %v2964_v50  ;;  %1050 = vmatpush.msrb.mxu1 %v2965_v9 }
 0x1d7   : > { %1070 = vmatpush.msrb.mxu2 %v2966_v62  ;;  %1093 = vmatpush.msrb.mxu3 %v2967_v7 }
 0x1d8   : > { %1028 = vmatpush.msrb.mxu0 %v2968_v60  ;;  %1051 = vmatpush.msrb.mxu1 %v2969_v19 }
 0x1d9   : > { %1071 = vmatpush.msrb.mxu2 %v2970_v14  ;;  %1094 = vmatpush.msrb.mxu3 %v2971_v21 }
 0x1da   : > { %1029 = vmatpush.msrb.mxu0 %v2972_v15  ;;  %1052 = vmatpush.msrb.mxu1 %v2973_v41 }
 0x1db   : > { %1072 = vmatpush.msrb.mxu2 %v2974_v24  ;;  %1095 = vmatpush.msrb.mxu3 %v2975_v12 }
 0x1dc   : > { %1030 = vmatpush.msrb.mxu0 %v2976_v28  ;;  %1053 = vmatpush.msrb.mxu1 %v2977_v1 }
 0x1dd   : > { %1073 = vmatpush.msrb.mxu2 %v2978_v30  ;;  %1096 = vmatpush.msrb.mxu3 %v2979_v8 }
 0x1de   : > { %1031 = vmatpush.msrb.mxu0 %v2980_v10  ;;  %1054 = vmatpush.msrb.mxu1 %v2981_v40 }
 0x1df   : > { %1074 = vmatpush.msrb.mxu2 %v2982_v26  ;;  %1097 = vmatpush.msrb.mxu3 %v2983_v42 }
 0x1e0   : > { %1032 = vmatmul.f32.vlgmr.msrb.gmra.mxu0 %v1014_v61  ;;  %1055 = vmatmul.f32.vlgmr.msrb.gmra.mxu1 %v1014_v61 }
 0x1e1   : > { %1075 = vmatpush.msrb.mxu2 %v2984_v63  ;;  %1098 = vmatpush.msrb.mxu3 %v2985_v33 }
 0x1e3   : > { %1076 = vmatpush.msrb.mxu2 %v2986_v34  ;;  %1099 = vmatpush.msrb.mxu3 %v2987_v58 }
 0x1e5   : > { %1077 = vmatpush.msrb.mxu2 %v2988_v44  ;;  %1100 = vmatpush.msrb.mxu3 %v2989_v18 }
 0x1e6   : > { %1078 = vmatmul.f32.vlgmr.msrb.gmra.mxu2 %v1014_v61  ;;  %1101 = vmatmul.f32.vlgmr.msrb.gmra.mxu3 %v1014_v61 }
 0x1e8   : > { %1035 = vmatmul.f32.gmra.mxu0 %v1015_v25  ;;  %1058 = vmatmul.f32.gmra.mxu1 %v1015_v25 }
 0x1ee   : > { %1081 = vmatmul.f32.gmra.mxu2 %v1015_v25  ;;  %1104 = vmatmul.f32.gmra.mxu3 %v1015_v25 }
 0x25d   : > { %v1033_v29 = vpop.f32.mrf.mxu0  ;;  %v1056_v55 = vpop.f32.mrf.mxu1 }
 0x25e   : > { %v1034_v20 = vadd.f32 1e-06, %v1033_v29  ;;  %v1057_v3 = vadd.f32 1e-06, %v1056_v55 }
 0x260   : > { %1747 = vlog2.f32 %v1034_v20 }
 0x261   : > { %1749 = vlog2.f32 %v1057_v3 }
 0x265   : > { %v1036_v17 = vpop.f32.mrf.mxu0  ;;  %v1059_v46 = vpop.f32.mrf.mxu1 }
 0x266   : > { %v1748_v5 = vpop.eup %1747  ;;  %v1037_v6 = vadd.f32 1e-06, %v1036_v17  ;;  %v1060_v43 = vadd.f32 1e-06, %v1059_v46 }
 0x267   : > { %v1750_v22 = vpop.eup %1749  ;;  %v1109_v23 = vmul.f32 0.6931472, %v1748_v5 }
 0x268   : > { %v1111_v56 = vmul.f32 0.6931472, %v1750_v22  ;;  %1751 = vlog2.f32 %v1037_v6 }
 0x269   : > { %1129 = vst [vmem:[%s2695_s9] sm:$0xff] %v1109_v23  ;;  %v1079_v47 = vpop.f32.mrf.mxu2  ;;  %1753 = vlog2.f32 %v1060_v43  ;;  %v1102_v27 = vpop.f32.mrf.mxu3 }
 0x26a   : > { %1130 = vst [vmem:[%s2695_s9 + $0x8] sm:$0xff] %v1111_v56  ;;  %v1080_v16 = vadd.f32 1e-06, %v1079_v47  ;;  %v1103_v54 = vadd.f32 1e-06, %v1102_v27 }
 0x26c   : > { %1755 = vlog2.f32 %v1080_v16 }
 0x26d   : > { %1757 = vlog2.f32 %v1103_v54 }
 0x26e   : > { %v1752_v38 = vpop.eup %1751 }
 0x26f   : > { %v1754_v49 = vpop.eup %1753  ;;  %v1117_v2 = vmul.f32 0.6931472, %v1752_v38 }
 0x270   : > { %v1119_v57 = vmul.f32 0.6931472, %v1754_v49 }
 0x271   : > { %1133 = vst [vmem:[%s2695_s9 + $0x40] sm:$0xff] %v1117_v2  ;;  %v1082_v35 = vpop.f32.mrf.mxu2  ;;  %v1105_v52 = vpop.f32.mrf.mxu3 }
 0x272   : > { %v1756_v36 = vpop.eup %1755  ;;  %1134 = vst [vmem:[%s2695_s9 + $0x48] sm:$0xff] %v1119_v57  ;;  %v1083_v39 = vadd.f32 1e-06, %v1082_v35  ;;  %v1106_v53 = vadd.f32 1e-06, %v1105_v52 }
 0x273   : > { %v1758_v31 = vpop.eup %1757  ;;  %v1113_v4 = vmul.f32 0.6931472, %v1756_v36 }
 0x274   : > { %v1115_v37 = vmul.f32 0.6931472, %v1758_v31  ;;  %1759 = vlog2.f32 %v1083_v39 }
 0x275   : > { %1131 = vst [vmem:[%s2695_s9 + $0x10] sm:$0xff] %v1113_v4  ;;  %1761 = vlog2.f32 %v1106_v53 }
 0x276   : > { %1132 = vst [vmem:[%s2695_s9 + $0x18] sm:$0xff] %v1115_v37 }
 0x27a   : > { %v1760_v45 = vpop.eup %1759  ;;  %1140 = sbr.rel (%p1600_p3) target bundleno = 952 (0x3b8), region = 40 }
 0x27b   : > { %v1762_v0 = vpop.eup %1761  ;;  %v1121_v51 = vmul.f32 0.6931472, %v1760_v45 }
 0x27c   : > { %v1123_v11 = vmul.f32 0.6931472, %v1762_v0 }
 0x27d   : > { %1135 = vst [vmem:[%s2695_s9 + $0x50] sm:$0xff] %v1121_v51 }
 0x27e   : > { %1136 = vst [vmem:[%s2695_s9 + $0x58] sm:$0xff] %v1123_v11 }
 0x27f   : > { %v1926_v18 = vmov 1024.0  }
 0x280   : > { %1763 = vrcp.f32 %v1926_v18 }
 0x285   : > { %v1141_v59 = vld [vmem:[%s2692_s8] sm:$0xff]  ;;  %v1142_v32 = vld [vmem:[%s2692_s8 + $0x8] sm:$0xff]  ;;  %v1143_v48 = vld [vmem:[%s2692_s8 + $0x10] sm:$0xff] }
 0x286   : > { %v1157_v13 = vadd.f32 %v1142_v32, %v1141_v59  ;;  %v1144_v50 = vld [vmem:[%s2692_s8 + $0x18] sm:$0xff]  ;;  %v1149_v9 = vld [vmem:[%s2692_s8 + $0x40] sm:$0xff]  ;;  %v1150_v7 = vld [vmem:[%s2692_s8 + $0x48] sm:$0xff]  ;;  %v1764_v25 = vpop.eup %1763 }
 0x287   : > { %v1151_v60 = vld [vmem:[%s2692_s8 + $0x50] sm:$0xff]  ;;  %v1145_v19 = vld [vmem:[%s2692_s8 + $0x20] sm:$0xff]  ;;  %v1166_v14 = vadd.f32 %v1150_v7, %v1149_v9  ;;  %v1152_v15 = vld [vmem:[%s2692_s8 + $0x58] sm:$0xff]  ;;  %v1176_v29 = vmul.f32 1024.0, %v1764_v25  ;;  %vm1180_vm1 = vweird.f32 %v1764_v25 }
 0x288   : > { %v1158_v62 = vadd.f32 %v1157_v13, %v1143_v48  ;;  %v1146_v41 = vld [vmem:[%s2692_s8 + $0x28] sm:$0xff]  ;;  %v1153_v28 = vld [vmem:[%s2692_s8 + $0x60] sm:$0xff]  ;;  %v1147_v1 = vld [vmem:[%s2692_s8 + $0x30] sm:$0xff] }
 0x289   : > { %v1167_v24 = vadd.f32 %v1166_v14, %v1151_v60  ;;  %v1154_v10 = vld [vmem:[%s2692_s8 + $0x68] sm:$0xff]  ;;  %v1148_v40 = vld [vmem:[%s2692_s8 + $0x38] sm:$0xff]  ;;  %v1155_v42 = vld [vmem:[%s2692_s8 + $0x70] sm:$0xff]  ;;  %v1177_v20 = vsub.f32 1.0, %v1176_v29 }
 0x28a   : > { %v1159_v21 = vadd.f32 %v1158_v62, %v1144_v50  ;;  %v1156_v58 = vld [vmem:[%s2692_s8 + $0x78] sm:$0xff] }
 0x28b   : > { %v1168_v30 = vadd.f32 %v1167_v24, %v1152_v15  ;;  %v1178_v55 = vmul.f32 %v1764_v25, %v1177_v20 }
 0x28c   : > { %v1160_v12 = vadd.f32 %v1159_v21, %v1145_v19 }
 0x28d   : > { %v1169_v26 = vadd.f32 %v1168_v30, %v1153_v28  ;;  %v1179_v3 = vadd.f32 %v1764_v25, %v1178_v55 }
 0x28e   : > { %v1161_v8 = vadd.f32 %v1160_v12, %v1146_v41 }
 0x28f   : > { %v1170_v63 = vadd.f32 %v1169_v26, %v1154_v10  ;;  %v1181_v17 = vsel %vm1180_vm1, %v1764_v25, %v1179_v3 }
 0x290   : > { %v1162_v61 = vadd.f32 %v1161_v8, %v1147_v1 }
 0x291   : > { %v1171_v34 = vadd.f32 %v1170_v63, %v1155_v42 }
 0x292   : > { %v1163_v33 = vadd.f32 %v1162_v61, %v1148_v40 }
 0x293   : > { %v1172_v44 = vadd.f32 %v1171_v34, %v1156_v58 }
 0x294   : > { %1164 = vadd.xlane.f32.xlu0 %v1163_v33 }
 0x29c   : > { %1173 = vadd.xlane.f32.xlu0 %v1172_v44 }
 0x307   : > { %v1165_v5 = vpop.xlane.xlu0 %1164 }
 0x308   : > { %v1182_v6 = vmul.f32 %v1181_v17, %v1165_v5 }
 0x30a   : > { %v2722_v46 = vsub.f32 %v1141_v59, %v1182_v6  ;;  %v2724_v22 = vsub.f32 %v1142_v32, %v1182_v6  ;;  %v2726_v23 = vsub.f32 %v1143_v48, %v1182_v6  ;;  %v2728_v43 = vsub.f32 %v1144_v50, %v1182_v6 }
 0x30b   : > { %v2734_v16 = vsub.f32 %v1145_v19, %v1182_v6  ;;  %v2738_v49 = vsub.f32 %v1146_v41, %v1182_v6  ;;  %v2742_v36 = vsub.f32 %v1147_v1, %v1182_v6  ;;  %v2752_v37 = vsub.f32 %v1148_v40, %v1182_v6 }
 0x30c   : > { %v1200_v56 = vmul.f32 %v2722_v46, %v2722_v46  ;;  %v1201_v47 = vmul.f32 %v2724_v22, %v2724_v22  ;;  %v1202_v27 = vmul.f32 %v2726_v23, %v2726_v23  ;;  %v1203_v57 = vmul.f32 %v2728_v43, %v2728_v43 }
 0x30d   : > { %v1204_v39 = vmul.f32 %v2734_v16, %v2734_v16  ;;  %v1205_v45 = vmul.f32 %v2738_v49, %v2738_v49  ;;  %v1206_v32 = vmul.f32 %v2742_v36, %v2742_v36  ;;  %v1207_v62 = vmul.f32 %v2752_v37, %v2752_v37 }
 0x30e   : > { %v1216_v54 = vadd.f32 %v1201_v47, %v1200_v56 }
 0x30f   : > { %v1174_v38 = vpop.xlane.xlu0 %1173 }
 0x310   : > { %v1183_v2 = vmul.f32 %v1181_v17, %v1174_v38  ;;  %v1217_v35 = vadd.f32 %v1216_v54, %v1202_v27 }
 0x312   : > { %v1218_v52 = vadd.f32 %v1217_v35, %v1203_v57  ;;  %v2746_v31 = vsub.f32 %v1149_v9, %v1183_v2  ;;  %v2748_v4 = vsub.f32 %v1150_v7, %v1183_v2  ;;  %v2750_v53 = vsub.f32 %v1151_v60, %v1183_v2 }
 0x313   : > { %v2756_v51 = vsub.f32 %v1152_v15, %v1183_v2  ;;  %v2764_v13 = vsub.f32 %v1153_v28, %v1183_v2  ;;  %v2770_v60 = vsub.f32 %v1154_v10, %v1183_v2  ;;  %v2774_v15 = vsub.f32 %v1155_v42, %v1183_v2 }
 0x314   : > { %v1219_v0 = vadd.f32 %v1218_v52, %v1204_v39  ;;  %v1208_v11 = vmul.f32 %v2746_v31, %v2746_v31  ;;  %v1209_v59 = vmul.f32 %v2748_v4, %v2748_v4  ;;  %v1210_v50 = vmul.f32 %v2750_v53, %v2750_v53 }
 0x315   : > { %v1211_v19 = vmul.f32 %v2756_v51, %v2756_v51  ;;  %v1212_v41 = vmul.f32 %v2764_v13, %v2764_v13  ;;  %v2778_v12 = vsub.f32 %v1156_v58, %v1183_v2  ;;  %v1213_v28 = vmul.f32 %v2770_v60, %v2770_v60 }
 0x316   : > { %v1220_v48 = vadd.f32 %v1219_v0, %v1205_v45  ;;  %v1225_v9 = vadd.f32 %v1209_v59, %v1208_v11  ;;  %v1214_v30 = vmul.f32 %v2774_v15, %v2774_v15 }
 0x317   : > { %v1215_v10 = vmul.f32 %v2778_v12, %v2778_v12 }
 0x318   : > { %v1221_v7 = vadd.f32 %v1220_v48, %v1206_v32  ;;  %v1226_v14 = vadd.f32 %v1225_v9, %v1210_v50 }
 0x31a   : > { %v1222_v21 = vadd.f32 %v1221_v7, %v1207_v62  ;;  %v1227_v24 = vadd.f32 %v1226_v14, %v1211_v19 }
 0x31c   : > { %1223 = vadd.xlane.f32.xlu1 %v1222_v21  ;;  %v1228_v1 = vadd.f32 %v1227_v24, %v1212_v41 }
 0x31e   : > { %v1229_v8 = vadd.f32 %v1228_v1, %v1213_v28 }
 0x320   : > { %v1230_v40 = vadd.f32 %v1229_v8, %v1214_v30 }
 0x322   : > { %v1231_v26 = vadd.f32 %v1230_v40, %v1215_v10 }
 0x324   : > { %1232 = vadd.xlane.f32.xlu1 %v1231_v26 }
 0x38f   : > { %v1224_v61 = vpop.xlane.xlu1 %1223 }
 0x390   : > { %v1234_v42 = vmul.f32 %v1224_v61, %v1181_v17 }
 0x392   : > { %v1236_v63 = vadd.f32 1e-05, %v1234_v42 }
 0x394   : > { %1765 = vrsqrt.f32 %v1236_v63  ;;  %vm1244_vm3 = vweird.f32 %v1236_v63 }
 0x397   : > { %v1233_v33 = vpop.xlane.xlu1 %1232 }
 0x398   : > { %v1235_v34 = vmul.f32 %v1233_v33, %v1181_v17 }
 0x39a   : > { %v1766_v58 = vpop.eup %1765  ;;  %v1237_v44 = vadd.f32 1e-05, %v1235_v34 }
 0x39b   : > { %v1239_v18 = vmul.f32 %v1766_v58, %v1236_v63  ;;  %vm1245_vm2 = vweird.f32 %v1766_v58 }
 0x39c   : > { %1767 = vrsqrt.f32 %v1237_v44  ;;  %vm1246_vm4 = vmor %vm1244_vm3, %vm1245_vm2  ;;  %vm1254_vm6 = vweird.f32 %v1237_v44 }
 0x39d   : > { %v1240_v25 = vmul.f32 %v1766_v58, %v1239_v18 }
 0x39f   : > { %v1241_v29 = vmul.f32 0.5, %v1240_v25 }
 0x3a1   : > { %v1242_v20 = vsub.f32 1.5, %v1241_v29 }
 0x3a2   : > { %v1768_v55 = vpop.eup %1767 }
 0x3a3   : > { %v1243_v3 = vmul.f32 %v1766_v58, %v1242_v20  ;;  %v1249_v5 = vmul.f32 %v1768_v55, %v1237_v44  ;;  %vm1255_vm5 = vweird.f32 %v1768_v55 }
 0x3a4   : > { %vm1256_vm7 = vmor %vm1254_vm6, %vm1255_vm5 }
 0x3a5   : > { %v1247_v6 = vsel %vm1246_vm4, %v1766_v58, %v1243_v3  ;;  %v1250_v56 = vmul.f32 %v1768_v55, %v1249_v5 }
 0x3a6   : > { %v1258_v17 = vmul.f32 %v1247_v6, %v2722_v46  ;;  %v1259_v47 = vmul.f32 %v1247_v6, %v2724_v22  ;;  %v1260_v27 = vmul.f32 %v1247_v6, %v2726_v23  ;;  %v1261_v54 = vmul.f32 %v1247_v6, %v2728_v43 }
 0x3a7   : > { %v1262_v38 = vmul.f32 %v1247_v6, %v2734_v16  ;;  %v1251_v2 = vmul.f32 0.5, %v1250_v56  ;;  %v1263_v57 = vmul.f32 %v1247_v6, %v2738_v49  ;;  %v1264_v35 = vmul.f32 %v1247_v6, %v2742_v36 }
 0x3a8   : > { %1274 = vst [vmem:[%s2692_s8] sm:$0xff] %v1258_v17  ;;  %v1265_v22 = vmul.f32 %v1247_v6, %v2752_v37 }
 0x3a9   : > { %1275 = vst [vmem:[%s2692_s8 + $0x8] sm:$0xff] %v1259_v47  ;;  %v1252_v46 = vsub.f32 1.5, %v1251_v2 }
 0x3aa   : > { %1276 = vst [vmem:[%s2692_s8 + $0x10] sm:$0xff] %v1260_v27 }
 0x3ab   : > { %1277 = vst [vmem:[%s2692_s8 + $0x18] sm:$0xff] %v1261_v54  ;;  %v1253_v23 = vmul.f32 %v1768_v55, %v1252_v46 }
 0x3ac   : > { %1278 = vst [vmem:[%s2692_s8 + $0x20] sm:$0xff] %v1262_v38 }
 0x3ad   : > { %1279 = vst [vmem:[%s2692_s8 + $0x28] sm:$0xff] %v1263_v57  ;;  %v1257_v43 = vsel %vm1256_vm7, %v1768_v55, %v1253_v23 }
 0x3ae   : > { %1280 = vst [vmem:[%s2692_s8 + $0x30] sm:$0xff] %v1264_v35  ;;  %v1266_v16 = vmul.f32 %v1257_v43, %v2746_v31  ;;  %v1267_v49 = vmul.f32 %v1257_v43, %v2748_v4  ;;  %v1268_v36 = vmul.f32 %v1257_v43, %v2750_v53  ;;  %v1269_v39 = vmul.f32 %v1257_v43, %v2756_v51 }
 0x3af   : > { %1281 = vst [vmem:[%s2692_s8 + $0x38] sm:$0xff] %v1265_v22  ;;  %v1270_v52 = vmul.f32 %v1257_v43, %v2764_v13  ;;  %v1271_v37 = vmul.f32 %v1257_v43, %v2770_v60  ;;  %v1272_v45 = vmul.f32 %v1257_v43, %v2774_v15  ;;  %v1273_v0 = vmul.f32 %v1257_v43, %v2778_v12 }
 0x3b0   : > { %1282 = vst [vmem:[%s2692_s8 + $0x40] sm:$0xff] %v1266_v16 }
 0x3b1   : > { %1283 = vst [vmem:[%s2692_s8 + $0x48] sm:$0xff] %v1267_v49 }
 0x3b2   : > { %1284 = vst [vmem:[%s2692_s8 + $0x50] sm:$0xff] %v1268_v36 }
 0x3b3   : > { %1285 = vst [vmem:[%s2692_s8 + $0x58] sm:$0xff] %v1269_v39 }
 0x3b4   : > { %1286 = vst [vmem:[%s2692_s8 + $0x60] sm:$0xff] %v1270_v52 }
 0x3b5   : > { %1287 = vst [vmem:[%s2692_s8 + $0x68] sm:$0xff] %v1271_v37 }
 0x3b6   : > { %1288 = vst [vmem:[%s2692_s8 + $0x70] sm:$0xff] %v1272_v45 }
 0x3b7   : > { %1289 = vst [vmem:[%s2692_s8 + $0x78] sm:$0xff] %v1273_v0 }
 0x3b8 PF: > { %s1638_s18 = sshll.u32 %s1909_s19, 7  ;;  %s1303_s6 = sshll.u32 %s2692_s8, 4  ;;  %s1304_s6 = int_to_ptr.vmem [resolvable:$true] %s1303_s6 }
 0x3b9   : > { %s1302_s5 = scalar_lea.hbm %s2875_s3, %s1638_s18  ;;  %s1291_s27 = scalar_lea.sflag [#allocation4], %s204_s14 }
 0x3ba   : > { %s1305_s30 = sshll.u32 %s1302_s5, 4  ;;  %s1819_s19 = scalar_lea.hbm %s2875_s3, 256  ;;  %s1306_s30 = int_to_ptr.hbm [resolvable:$true] %s1305_s30 }
 0x3bb   : > { %s1813_s24 = sshra.s32 %s1306_s30, 4  ;;  %s1814_s24 = int_to_ptr.hbm [resolvable:$true] %s1813_s24 }
 0x3bc   : > { %s1815_s26 = scalar_lea.hbm %s1814_s24, 128  ;;  %p1820_p11 = scmp.lt.s32.totalorder %s1814_s24, %s2875_s3 }
 0x3bd   : > { %p1816_p7 = scmp.ne.s32.totalorder %s1814_s24, %s1815_s26  ;;  %p1821_p13 = scmp.lt.s32.totalorder %s1819_s19, %s1815_s26 }
 0x3bf   : > { %p1817_p9 = pnand %p1816_p7, %p2031_p12  ;;  %p1822_p0 = por %p1821_p13, %p1820_p11 }
 0x3c1   : > { %p1818_p10 = pneg %p1817_p9 }
 0x3c3   : > { %p1823_p1 = pnand %p1822_p0, %p1818_p10 }
 0x3c5   : > { %1826 = shalt.err (!%p1823_p1)
}
 0x3c6   : > { %s1927_s14 = smov 1024   ;;  %s1928_s20 = smov 64  }
 0x3c7   : > { %1641 = dma.vmem_to_hbm [thread:$0]  (%p2031_p12), %s1304_s6, 2048, %s1306_s30, %s1291_s27, %s1927_s14, %s1927_s14, %s1928_s20  }
 0x3c8 PF: > { %p1652_p4 = scmp.ge.s32.totalorder %s1921_s22, 2  ;;  %s1320_s25 = sand.u32 1, %s1881_s12  }
 0x3c9   : > { %s1321_s4 = scalar_lea.sflag [#allocation4], %s1320_s25 }
 0x3ca   : > { %p1648_p5 = pnand %p1652_p4, %p2044_p2 }
 0x3cc   : > { %p1649_p6 = pneg %p1648_p5 }
 0x3ce   : > { %1876 = dma.done.wait (%p1649_p6), %s1321_s4, 2048  }
 0x3cf   : > { %1878 = vsyncadd (%p1649_p6), %s1321_s4, 4294965248  ;;  %s19_s22 = sadd.s32 1, %s1921_s22   ;;  %s2990_s8 = sld [smem:[#allocation8_spill]] }
 0x3d0   : > { %p16_p8 = scmp.ge.s32.totalorder %s19_s22, 6   ;;  %s2991_s14 = sld [smem:[#allocation13_spill]] }
 0x3d1   : > { %s2992_s7 = sld [smem:[#allocation9_spill]]  ;;  %s2997_s12 = smov %s1885_s13 }
 0x3d2   : > { %s2993_s17 = sld [smem:[#allocation14_spill]]  ;;  %s2999_s15 = smov %s1897_s16 }
 0x3d3   : > { %s2994_s18 = sld [smem:[#allocation10_spill]]  ;;  %s3001_s19 = smov %s1917_s21 }
 0x3d4   : > { %s2995_s20 = sld [smem:[#allocation11_spill]] }
 0x3d5   : > { %s2996_s9 = sld [smem:[#allocation12_spill]]  ;;  %s2998_s13 = smov %s2990_s8 }
 0x3d7   : > { %s3000_s16 = smov %s2992_s7  ;;  %18 = sbr.rel (!%p16_p8) target bundleno = 9 (0x9), region = 82 }
 0x3db   : > { %s3002_s21 = smov %s2996_s9 }
 0x3dc   :  { %1327 = vsyncpa [#allocation3], 1 }
 0x3dd   :  { %1329 = vsyncpa [#allocation3 + $0x1], 1 }
 0x3de   :  { %1330 = vsyncpa [#allocation4], 1 }
 0x3df   :  { %1332 = vsyncpa [#allocation4 + $0x1], 1 }

</bundles_post_ra>
